<compile_context>
chip_gen: v5e
topology: v5e:2x2
jax: 0.10.0
libtpu: 0.0.40
codegen_flags: <defaults>
</compile_context>

<pallas_src>
import functools

import jax
import jax.numpy as jnp
from jax import lax
from jax.experimental import pallas as pl
from jax.experimental.pallas import tpu as pltpu


def _round_up(x, m):
    return ((x + m - 1) // m) * m


# ----------------------------------------------------------------------------
# Fused kernel:
#   1x1 expand (+BN+ReLU6) -> depthwise KxK (+BN+ReLU6) -> 1x1 project (+BN)
# ----------------------------------------------------------------------------
def _fused_mbconv_kernel(
    x_ref,
    w_exp_ref, s_exp_ref, b_exp_ref,
    w_dw_ref, s_dw_ref, b_dw_ref,
    w_pw_ref, s_pw_ref, b_pw_ref,
    o_ref,
    e_ref,
    *, H, W, Wp8, K, sh, sw, pad, th, th_in, Wo, T,
    expand_act, compute_dtype, out_transposed,
):
    t = pl.program_id(1)
    F = w_exp_ref.shape[1]

    # -- stage 1: 1x1 expand conv (+BN+ReLU6) over the th_in padded rows of this tile
    start = t * (th * sh) * Wp8                      # Wp8 % 8 == 0 -> always aligned
    start = pl.multiple_of(start, 8)
    win = x_ref[pl.ds(start, th_in * Wp8), :]                       # (th_in*Wp8, Cin)
    y = jnp.dot(win, w_exp_ref[...], preferred_element_type=jnp.float32)
    if expand_act:
        y = jnp.clip(y * s_exp_ref[...] + b_exp_ref[...], 0.0, 6.0)
    e_ref[...] = y.reshape(th_in, Wp8, F).astype(e_ref.dtype)       # (th_in, Wp8, F)

    # Re-zero the conv zero-padding positions (the expand BN shift + ReLU6 made
    # them nonzero).  Column pads are fully static; row pads depend only on the
    # (static) tile id, so a couple of pl.when blocks cover them.
    if expand_act and pad > 0:
        e_ref[:, 0:pad, :] = jnp.zeros((th_in, pad, F), e_ref.dtype)
        e_ref[:, W + pad:W + 2 * pad, :] = jnp.zeros((th_in, pad, F), e_ref.dtype)
        for tt in range(T):
            top = min(th_in, max(0, pad - tt * th * sh))
            bot = max(0, min(th_in, pad + H - tt * th * sh))
            if top > 0:
                @pl.when(t == tt)
                def _(top=top):
                    e_ref[0:top, :, :] = jnp.zeros((top, Wp8, F), e_ref.dtype)
            if bot < th_in:
                @pl.when(t == tt)
                def _(bot=bot):
                    e_ref[bot:th_in, :, :] = jnp.zeros((th_in - bot, Wp8, F), e_ref.dtype)

    # -- stage 2: depthwise KxK (+BN+ReLU6), tap-major: K*K big (th, Wo, F) VPU ops
    w_dw = w_dw_ref[...]                                            # (K*K, F) f32
    acc = jnp.zeros((th, Wo, F), jnp.float32)
    for kh in range(K):
        for kw in range(K):
            if sh == 1:
                rows = slice(kh, kh + th)
            else:
                rows = pl.ds(kh, th, sh)    # TODO(synk): only stride (1, 1) exercised.
            if sw == 1:
                cols = slice(kw, kw + Wo)
            else:
                cols = pl.ds(kw, Wo, sw)    # TODO(synk): only stride (1, 1) exercised.
            acc = acc + e_ref[rows, cols, :].astype(jnp.float32) * w_dw[kh * K + kw]
    d = jnp.clip(acc * s_dw_ref[...] + b_dw_ref[...], 0.0, 6.0)

    # -- stage 3: 1x1 project conv + BN straight from registers (no d scratch) ------
    # TODO(synk): if Wo is not a multiple of 8 the (th, Wo, F)->(th*Wo, F) merge
    # forces a relayout; pad the row pitch to round_up(Wo, 8) in that case.
    d2 = d.astype(compute_dtype).reshape(th * Wo, F)
    yo = jnp.dot(d2, w_pw_ref[...], preferred_element_type=jnp.float32)
    yo = yo * s_pw_ref[...] + b_pw_ref[...]
    if out_transposed:
        o_ref[...] = jnp.transpose(yo).astype(o_ref.dtype)          # (Co, th*Wo)
    else:
        o_ref[...] = yo.astype(o_ref.dtype)                         # (th*Wo, Co)


# ----------------------------------------------------------------------------
# Parameter construction / padding (done once, outside the hot path)
# ----------------------------------------------------------------------------
def bn_fold(gamma, beta, mean, var, eps=1e-5):
    scale = gamma / jnp.sqrt(var + eps)
    shift = beta - mean * scale
    return scale, shift


def make_params(key, in_channels, out_channels, kernel_size, expand_ratio, mid_channels=None):
    feat = int(in_channels * expand_ratio) if mid_channels is None else mid_channels
    ks = jax.random.split(key, 6)

    def bn_params(k, c):
        k1, k2, k3, k4 = jax.random.split(k, 4)
        gamma = jax.random.uniform(k1, (c,), jnp.float32, 0.5, 1.5)
        beta = jax.random.normal(k2, (c,), jnp.float32) * 0.1
        mean = jax.random.normal(k3, (c,), jnp.float32) * 0.1
        var = jax.random.uniform(k4, (c,), jnp.float32, 0.5, 1.5)
        return gamma, beta, mean, var

    p = {"feat": feat}
    # inverted bottleneck 1x1: torch weight (feat, Cin, 1, 1) -> (Cin, feat)
    p["w_exp"] = jax.random.normal(ks[0], (in_channels, feat), jnp.float32) * 0.1
    p["bn_exp"] = bn_fold(*bn_params(ks[1], feat))
    # depthwise conv: torch weight (feat, 1, K, K) -> (K, K, feat)
    p["w_dw"] = jax.random.normal(ks[2], (kernel_size, kernel_size, feat), jnp.float32) * 0.1
    p["bn_dw"] = bn_fold(*bn_params(ks[3], feat))
    # pointwise conv: torch weight (Cout, feat, 1, 1) -> (feat, Cout)
    p["w_pw"] = jax.random.normal(ks[4], (feat, out_channels), jnp.float32) * 0.1
    p["bn_pw"] = bn_fold(*bn_params(ks[5], out_channels))
    return p


def prepare_kernel_params(p, in_channels, out_channels, kernel_size, expand_ratio,
                          compute_dtype=jnp.bfloat16, lane_multiple=128):
    """Zero-pad channel dims to lane-dense multiples and pre-cast MXU weights.

    TODO(synk): on v6e/v7x use lane_multiple=256 when feat/out_channels >= ~192 so
    the 2x256^2 MXU is fully fed; 128 is already optimal on v5e (4x128^2 MXU).
    """
    feat = p["feat"]
    K = kernel_size
    F = _round_up(feat, lane_multiple)
    Co = _round_up(out_channels, lane_multiple)

    def padded(a, shape):
        out = jnp.zeros(shape, a.dtype)
        return out.at[tuple(slice(0, s) for s in a.shape)].set(a)

    kp = {"F": F, "Co": Co, "expand_act": expand_ratio != 1, "compute_dtype": compute_dtype}
    if expand_ratio != 1:
        kp["w_exp"] = padded(p["w_exp"], (in_channels, F)).astype(compute_dtype)
        s, b = p["bn_exp"]
        kp["s_exp"] = padded(s.reshape(1, -1), (1, F))
        kp["b_exp"] = padded(b.reshape(1, -1), (1, F))
    else:
        # no inverted bottleneck: route the input through an identity 1x1 "expand"
        kp["w_exp"] = padded(jnp.eye(in_channels, dtype=jnp.float32),
                             (in_channels, F)).astype(compute_dtype)
        kp["s_exp"] = jnp.zeros((1, F), jnp.float32)
        kp["b_exp"] = jnp.zeros((1, F), jnp.float32)

    kp["w_dw"] = padded(p["w_dw"].reshape(K * K, feat), (K * K, F))     # keep f32 (VPU acc)
    s, b = p["bn_dw"]
    kp["s_dw"] = padded(s.reshape(1, -1), (1, F))
    kp["b_dw"] = padded(b.reshape(1, -1), (1, F))

    kp["w_pw"] = padded(p["w_pw"], (F, Co)).astype(compute_dtype)
    s, b = p["bn_pw"]
    kp["s_pw"] = padded(s.reshape(1, -1), (1, Co))
    kp["b_pw"] = padded(b.reshape(1, -1), (1, Co))
    return kp


# ----------------------------------------------------------------------------
# Public forward (NCHW in / NCHW out, matches the PyTorch module in eval mode)
# ----------------------------------------------------------------------------
def mb_inverted_conv_forward(x_nchw, kparams, *, kernel_size, stride, out_channels,
                             row_tile=8):
    B, Cin, H, W = x_nchw.shape
    K = kernel_size
    sh, sw = stride
    pad = K // 2
    Ho = (H + 2 * pad - K) // sh + 1
    Wo = (W + 2 * pad - K) // sw + 1
    Hp = H + 2 * pad
    Wp8 = _round_up(W + 2 * pad, 8)              # padded width rounded to a sublane multiple
    F, Co = kparams["F"], kparams["Co"]
    compute_dtype = kparams["compute_dtype"]
    cbytes = jnp.dtype(compute_dtype).itemsize

    # Output-row tile: largest divisor of Ho <= row_tile whose f32 depthwise
    # accumulator (th, Wo, F) stays register/VMEM friendly.
    # TODO(synk): switch to pl.cdiv + a masked ragged last tile so an Ho with no
    # small divisor does not degrade to th == 1.
    th = 1
    for d in range(1, min(Ho, row_tile) + 1):
        if Ho % d == 0 and d * Wo * F * 4 <= 128 * 1024:
            th = d
    T = Ho // th
    th_in = (th - 1) * sh + K                    # padded input rows needed per row tile

    # Pre-pad the NHWC input once in HBM (cheap: a Cin-wide tensor), cast to the
    # MXU compute dtype, and flatten rows so the kernel slices th_in*Wp8 rows.
    # TODO(synk): fold the NCHW->NHWC transpose into the kernel to drop this HBM pass.
    x_nhwc = jnp.transpose(x_nchw, (0, 2, 3, 1)).astype(compute_dtype)
    x_pad = jnp.pad(x_nhwc, ((0, 0), (pad, Hp - H - pad), (pad, Wp8 - W - pad), (0, 0)))
    x_pad = x_pad.reshape(B, Hp * Wp8, Cin)

    # Lane-dense channel-major output (no post-kernel activation transpose) when
    # the spatial tile is a multiple of 128 lanes; otherwise fall back to NHWC.
    out_transposed = (th * Wo) % 128 == 0
    if out_transposed:
        out_shape = jax.ShapeDtypeStruct((B, Co, Ho * Wo), jnp.float32)
        out_spec = pl.BlockSpec((pl.Squeezed(), Co, th * Wo), lambda b, t: (b, 0, t))
    else:
        out_shape = jax.ShapeDtypeStruct((B, Ho * Wo, Co), jnp.float32)
        out_spec = pl.BlockSpec((pl.Squeezed(), th * Wo, Co), lambda b, t: (b, t, 0))

    kernel = functools.partial(
        _fused_mbconv_kernel,
        H=H, W=W, Wp8=Wp8, K=K, sh=sh, sw=sw, pad=pad,
        th=th, th_in=th_in, Wo=Wo, T=T,
        expand_act=kparams["expand_act"], compute_dtype=compute_dtype,
        out_transposed=out_transposed)

    # Explicit VMEM budget (double-buffered blocks + scratch), generation-safe
    # (<= 64 MiB so it also fits v7x physical VMEM).
    vmem_est = (
        2 * Hp * Wp8 * Cin * cbytes                       # x block (double buffered)
        + 2 * (Cin * F + F * Co) * cbytes                 # MXU weights
        + 2 * (K * K * F + 4 * F) * 4 + 2 * 2 * Co * 4    # dw weights + BN vectors
        + 2 * th * Wo * Co * 4                            # output block
        + th_in * Wp8 * F * cbytes)                       # expanded-activation scratch
    vmem_limit = int(min(64 * 2**20, max(32 * 2**20, 2 * vmem_est)))

    cost = pl.CostEstimate(
        flops=2 * B * (Hp * Wp8 * Cin * F + Ho * Wo * K * K * F + Ho * Wo * F * Co),
        transcendentals=0,
        bytes_accessed=int(B * Hp * Wp8 * Cin * cbytes + B * Ho * Wo * Co * 4
                           + (Cin * F + F * Co) * cbytes
                           + (K * K * F + 4 * F + 2 * Co) * 4))

    # TODO(synk): on jax versions that support BlockSpec(pipeline_mode=pl.Buffered(1)),
    # single-buffer the grid-invariant weight/BN specs below (matters for large feat).
    def const2d(shp):
        return pl.BlockSpec(shp, lambda b, t: (0, 0))

    out = pl.pallas_call(
        kernel,
        out_shape=out_shape,
        grid_spec=pltpu.PrefetchScalarGridSpec(
            num_scalar_prefetch=0,
            grid=(B, T),
            in_specs=[
                pl.BlockSpec((pl.Squeezed(), Hp * Wp8, Cin), lambda b, t: (b, 0, 0)),
                const2d((Cin, F)),
                const2d((1, F)),
                const2d((1, F)),
                const2d((K * K, F)),
                const2d((1, F)),
                const2d((1, F)),
                const2d((F, Co)),
                const2d((1, Co)),
                const2d((1, Co)),
            ],
            out_specs=out_spec,
            scratch_shapes=[
                pltpu.VMEM((th_in, Wp8, F), compute_dtype),   # expanded activation tile
            ],
        ),
        compiler_params=pltpu.CompilerParams(
            dimension_semantics=("parallel", "parallel"),
            vmem_limit_bytes=vmem_limit),
        cost_estimate=cost,
    )(x_pad,
      kparams["w_exp"], kparams["s_exp"], kparams["b_exp"],
      kparams["w_dw"], kparams["s_dw"], kparams["b_dw"],
      kparams["w_pw"], kparams["s_pw"], kparams["b_pw"])

    if out_transposed:
        out = out.reshape(B, Co, Ho, Wo)[:, :out_channels]           # already NCHW
    else:
        out = out.reshape(B, Ho, Wo, Co)[:, :, :, :out_channels]
        out = jnp.transpose(out, (0, 3, 1, 2))                       # NHWC -> NCHW
    return out


# ----------------------------------------------------------------------------
# Plain-JAX (lax.conv) reference, NCHW, mirrors the PyTorch module (eval BN)
# ----------------------------------------------------------------------------
def reference_forward(x_nchw, params, *, kernel_size, stride, expand_ratio):
    feat = params["feat"]
    x = x_nchw

    def affine(x, scale, shift):
        return x * scale[None, :, None, None] + shift[None, :, None, None]

    if expand_ratio != 1:
        w = jnp.transpose(params["w_exp"], (1, 0))[:, :, None, None]
        x = lax.conv_general_dilated(x, w, (1, 1), "VALID",
                                     dimension_numbers=("NCHW", "OIHW", "NCHW"))
        x = jnp.clip(affine(x, *params["bn_exp"]), 0.0, 6.0)

    pad = kernel_size // 2
    w_dw = jnp.transpose(params["w_dw"], (2, 0, 1))[:, None, :, :]
    x = lax.conv_general_dilated(x, w_dw, stride, ((pad, pad), (pad, pad)),
                                 dimension_numbers=("NCHW", "OIHW", "NCHW"),
                                 feature_group_count=feat)
    x = jnp.clip(affine(x, *params["bn_dw"]), 0.0, 6.0)

    w_pw = jnp.transpose(params["w_pw"], (1, 0))[:, :, None, None]
    x = lax.conv_general_dilated(x, w_pw, (1, 1), "VALID",
                                 dimension_numbers=("NCHW", "OIHW", "NCHW"))
    x = affine(x, *params["bn_pw"])
    return x


if __name__ == "__main__":
    in_channels, out_channels = 4, 4
    kernel_size, stride, expand_ratio = 3, (1, 1), 6
    B, H, W = 2, 16, 16

    key = jax.random.PRNGKey(0)
    kx, kp = jax.random.split(key)
    x = jax.random.normal(kx, (B, in_channels, H, W), jnp.float32)

    params = make_params(kp, in_channels, out_channels, kernel_size, expand_ratio)
    kparams = prepare_kernel_params(params, in_channels, out_channels, kernel_size,
                                    expand_ratio)

    out = mb_inverted_conv_forward(x, kparams, kernel_size=kernel_size, stride=stride,
                                   out_channels=out_channels)
    out = jax.block_until_ready(out)

    ref = reference_forward(x, params, kernel_size=kernel_size, stride=stride,
                            expand_ratio=expand_ratio)
    ref = jax.block_until_ready(ref)

    assert out.shape == ref.shape == (B, out_channels, H, W)
    max_err = float(jnp.max(jnp.abs(out - ref)))
    # bf16 MXU matmuls + bf16 expanded-activation storage (f32 accumulation) give
    # small drift vs. the f32 reference.
    assert jnp.allclose(out, ref, atol=2e-2, rtol=2e-2), max_err
    print("KERNEL_OK")
</pallas_src>

<mosaic_0001>
module attributes {stable_mosaic.version = 11 : i64} {
  func.func @_fused_mbconv_kernel(%arg0: i32, %arg1: i32, %arg2: memref<1x432x4xbf16, #tpu.memory_space<vmem>>, %arg3: memref<4x128xbf16, #tpu.memory_space<vmem>>, %arg4: memref<1x128xf32, #tpu.memory_space<vmem>>, %arg5: memref<1x128xf32, #tpu.memory_space<vmem>>, %arg6: memref<9x128xf32, #tpu.memory_space<vmem>>, %arg7: memref<1x128xf32, #tpu.memory_space<vmem>>, %arg8: memref<1x128xf32, #tpu.memory_space<vmem>>, %arg9: memref<128x128xbf16, #tpu.memory_space<vmem>>, %arg10: memref<1x128xf32, #tpu.memory_space<vmem>>, %arg11: memref<1x128xf32, #tpu.memory_space<vmem>>, %arg12: memref<1x128x128xf32, #tpu.memory_space<vmem>>, %arg13: memref<10x24x128xbf16, #tpu.memory_space<vmem>>) attributes {dimension_semantics = [#tpu.dimension_semantics<parallel>, #tpu.dimension_semantics<parallel>], iteration_bounds = array<i64: 2, 2>, scalar_prefetch = 0 : i64, scratch_operands = 1 : i64, tpu.core_type = #tpu.core_type<tc>, window_params = [{transform_indices = @transform_0, window_bounds = array<i64: 1, 432, 4>}, {pipeline_mode = #tpu.pipeline_mode<synchronous>, transform_indices = @transform_1, window_bounds = array<i64: 4, 128>}, {pipeline_mode = #tpu.pipeline_mode<synchronous>, transform_indices = @transform_2, window_bounds = array<i64: 1, 128>}, {pipeline_mode = #tpu.pipeline_mode<synchronous>, transform_indices = @transform_3, window_bounds = array<i64: 1, 128>}, {pipeline_mode = #tpu.pipeline_mode<synchronous>, transform_indices = @transform_4, window_bounds = array<i64: 9, 128>}, {pipeline_mode = #tpu.pipeline_mode<synchronous>, transform_indices = @transform_5, window_bounds = array<i64: 1, 128>}, {pipeline_mode = #tpu.pipeline_mode<synchronous>, transform_indices = @transform_6, window_bounds = array<i64: 1, 128>}, {pipeline_mode = #tpu.pipeline_mode<synchronous>, transform_indices = @transform_7, window_bounds = array<i64: 128, 128>}, {pipeline_mode = #tpu.pipeline_mode<synchronous>, transform_indices = @transform_8, window_bounds = array<i64: 1, 128>}, {pipeline_mode = #tpu.pipeline_mode<synchronous>, transform_indices = @transform_9, window_bounds = array<i64: 1, 128>}, {transform_indices = @transform_10, window_bounds = array<i64: 1, 128, 128>}]} {
    %c8_i32 = arith.constant 8 : i32
    %0 = arith.muli %arg1, %c8_i32 : i32
    %c24_i32 = arith.constant 24 : i32
    %1 = arith.muli %0, %c24_i32 : i32
    %2 = tpu.assume_multiple %1, 8 : i32
    %c0 = arith.constant 0 : index
    %3 = arith.index_cast %2 : i32 to index
    %c0_0 = arith.constant 0 : index
    %4 = vector.load %arg2[%c0, %3, %c0_0] : memref<1x432x4xbf16, #tpu.memory_space<vmem>>, vector<1x240x4xbf16>
    %5 = vector.shape_cast %4 : vector<1x240x4xbf16> to vector<240x4xbf16>
    %c0_1 = arith.constant 0 : index
    %c0_2 = arith.constant 0 : index
    %6 = vector.load %arg3[%c0_1, %c0_2] : memref<4x128xbf16, #tpu.memory_space<vmem>>, vector<4x128xbf16>
    %cst = arith.constant dense<0.000000e+00> : vector<240x128xf32>
    %7 = tpu.matmul %5, %6, %cst {dimension_numbers = #tpu.dot_dimension_numbers<[1], [0], [0], [1], [0, 0, 1, 1], [], []>} : vector<240x4xbf16>, vector<4x128xbf16>, vector<240x128xf32> -> vector<240x128xf32>
    %c0_3 = arith.constant 0 : index
    %c0_4 = arith.constant 0 : index
    %8 = vector.load %arg4[%c0_3, %c0_4] : memref<1x128xf32, #tpu.memory_space<vmem>>, vector<1x128xf32>
    %9 = vector.broadcast %8 : vector<1x128xf32> to vector<240x128xf32>
    %10 = arith.mulf %7, %9 : vector<240x128xf32>
    %c0_5 = arith.constant 0 : index
    %c0_6 = arith.constant 0 : index
    %11 = vector.load %arg5[%c0_5, %c0_6] : memref<1x128xf32, #tpu.memory_space<vmem>>, vector<1x128xf32>
    %12 = vector.broadcast %11 : vector<1x128xf32> to vector<240x128xf32>
    %13 = arith.addf %10, %12 : vector<240x128xf32>
    %cst_7 = arith.constant 0.000000e+00 : f32
    %cst_8 = arith.constant 6.000000e+00 : f32
    %14 = vector.broadcast %cst_7 : f32 to vector<240x128xf32>
    %15 = arith.maximumf %14, %13 : vector<240x128xf32>
    %16 = vector.broadcast %cst_8 : f32 to vector<240x128xf32>
    %17 = arith.minimumf %16, %15 : vector<240x128xf32>
    %18 = vector.shape_cast %17 : vector<240x128xf32> to vector<10x24x128xf32>
    %19 = arith.truncf %18 : vector<10x24x128xf32> to vector<10x24x128xbf16>
    %c0_9 = arith.constant 0 : index
    %c0_10 = arith.constant 0 : index
    %c0_11 = arith.constant 0 : index
    %20 = vector.load %arg13[%c0_9, %c0_10, %c0_11] : memref<10x24x128xbf16, #tpu.memory_space<vmem>>, vector<10x24x128xbf16>
    tpu.vector_store %arg13[%c0_9, %c0_10, %c0_11], %19 {strides = array<i32>} : memref<10x24x128xbf16, #tpu.memory_space<vmem>>, vector<10x24x128xbf16>,
    %cst_12 = arith.constant 0.000000e+00 : bf16
    %21 = vector.broadcast %cst_12 : bf16 to vector<10x1x128xbf16>
    %c0_13 = arith.constant 0 : index
    %c0_14 = arith.constant 0 : index
    %c0_15 = arith.constant 0 : index
    %22 = vector.load %arg13[%c0_13, %c0_14, %c0_15] : memref<10x24x128xbf16, #tpu.memory_space<vmem>>, vector<10x1x128xbf16>
    tpu.vector_store %arg13[%c0_13, %c0_14, %c0_15], %21 {strides = array<i32>} : memref<10x24x128xbf16, #tpu.memory_space<vmem>>, vector<10x1x128xbf16>,
    %cst_16 = arith.constant 0.000000e+00 : bf16
    %23 = vector.broadcast %cst_16 : bf16 to vector<10x1x128xbf16>
    %c0_17 = arith.constant 0 : index
    %c17 = arith.constant 17 : index
    %c0_18 = arith.constant 0 : index
    %24 = vector.load %arg13[%c0_17, %c17, %c0_18] : memref<10x24x128xbf16, #tpu.memory_space<vmem>>, vector<10x1x128xbf16>
    tpu.vector_store %arg13[%c0_17, %c17, %c0_18], %23 {strides = array<i32>} : memref<10x24x128xbf16, #tpu.memory_space<vmem>>, vector<10x1x128xbf16>,
    %c0_i32 = arith.constant 0 : i32
    %25 = arith.cmpi eq, %arg1, %c0_i32 : i32
    %26 = arith.extui %25 : i1 to i32
    %c0_i32_19 = arith.constant 0 : i32
    %27 = arith.cmpi ne, %26, %c0_i32_19 : i32
    scf.if %27 {
      %cst_65 = arith.constant 0.000000e+00 : bf16
      %131 = vector.broadcast %cst_65 : bf16 to vector<1x24x128xbf16>
      %c0_66 = arith.constant 0 : index
      %c0_67 = arith.constant 0 : index
      %c0_68 = arith.constant 0 : index
      %132 = vector.load %arg13[%c0_66, %c0_67, %c0_68] : memref<10x24x128xbf16, #tpu.memory_space<vmem>>, vector<1x24x128xbf16>
      tpu.vector_store %arg13[%c0_66, %c0_67, %c0_68], %131 {strides = array<i32>} : memref<10x24x128xbf16, #tpu.memory_space<vmem>>, vector<1x24x128xbf16>,
    } else {
    }
    %c1_i32 = arith.constant 1 : i32
    %28 = arith.cmpi eq, %arg1, %c1_i32 : i32
    %29 = arith.extui %28 : i1 to i32
    %c0_i32_20 = arith.constant 0 : i32
    %30 = arith.cmpi ne, %29, %c0_i32_20 : i32
    scf.if %30 {
      %cst_65 = arith.constant 0.000000e+00 : bf16
      %131 = vector.broadcast %cst_65 : bf16 to vector<1x24x128xbf16>
      %c9 = arith.constant 9 : index
      %c0_66 = arith.constant 0 : index
      %c0_67 = arith.constant 0 : index
      %132 = vector.load %arg13[%c9, %c0_66, %c0_67] : memref<10x24x128xbf16, #tpu.memory_space<vmem>>, vector<1x24x128xbf16>
      tpu.vector_store %arg13[%c9, %c0_66, %c0_67], %131 {strides = array<i32>} : memref<10x24x128xbf16, #tpu.memory_space<vmem>>, vector<1x24x128xbf16>,
    } else {
    }
    %c0_21 = arith.constant 0 : index
    %c0_22 = arith.constant 0 : index
    %31 = vector.load %arg6[%c0_21, %c0_22] : memref<9x128xf32, #tpu.memory_space<vmem>>, vector<9x128xf32>
    %cst_23 = arith.constant 0.000000e+00 : f32
    %32 = vector.broadcast %cst_23 : f32 to vector<8x16x128xf32>
    %c0_24 = arith.constant 0 : index
    %c0_25 = arith.constant 0 : index
    %c0_26 = arith.constant 0 : index
    %33 = vector.load %arg13[%c0_24, %c0_25, %c0_26] : memref<10x24x128xbf16, #tpu.memory_space<vmem>>, vector<8x16x128xbf16>
    %34 = arith.extf %33 : vector<8x16x128xbf16> to vector<8x16x128xf32>
    %35 = vector.extract_strided_slice %31 {offsets = [0, 0], sizes = [1, 128], strides = [1, 1]} : vector<9x128xf32> to vector<1x128xf32>
    %36 = vector.shape_cast %35 : vector<1x128xf32> to vector<128xf32>
    %37 = vector.shape_cast %36 : vector<128xf32> to vector<1x1x128xf32>
    %38 = vector.broadcast %37 : vector<1x1x128xf32> to vector<8x16x128xf32>
    %39 = arith.mulf %34, %38 : vector<8x16x128xf32>
    %40 = arith.addf %32, %39 : vector<8x16x128xf32>
    %c0_27 = arith.constant 0 : index
    %c1 = arith.constant 1 : index
    %c0_28 = arith.constant 0 : index
    %41 = vector.load %arg13[%c0_27, %c1, %c0_28] : memref<10x24x128xbf16, #tpu.memory_space<vmem>>, vector<8x16x128xbf16>
    %42 = arith.extf %41 : vector<8x16x128xbf16> to vector<8x16x128xf32>
    %43 = vector.extract_strided_slice %31 {offsets = [1, 0], sizes = [1, 128], strides = [1, 1]} : vector<9x128xf32> to vector<1x128xf32>
    %44 = vector.shape_cast %43 : vector<1x128xf32> to vector<128xf32>
    %45 = vector.shape_cast %44 : vector<128xf32> to vector<1x1x128xf32>
    %46 = vector.broadcast %45 : vector<1x1x128xf32> to vector<8x16x128xf32>
    %47 = arith.mulf %42, %46 : vector<8x16x128xf32>
    %48 = arith.addf %40, %47 : vector<8x16x128xf32>
    %c0_29 = arith.constant 0 : index
    %c2 = arith.constant 2 : index
    %c0_30 = arith.constant 0 : index
    %49 = vector.load %arg13[%c0_29, %c2, %c0_30] : memref<10x24x128xbf16, #tpu.memory_space<vmem>>, vector<8x16x128xbf16>
    %50 = arith.extf %49 : vector<8x16x128xbf16> to vector<8x16x128xf32>
    %51 = vector.extract_strided_slice %31 {offsets = [2, 0], sizes = [1, 128], strides = [1, 1]} : vector<9x128xf32> to vector<1x128xf32>
    %52 = vector.shape_cast %51 : vector<1x128xf32> to vector<128xf32>
    %53 = vector.shape_cast %52 : vector<128xf32> to vector<1x1x128xf32>
    %54 = vector.broadcast %53 : vector<1x1x128xf32> to vector<8x16x128xf32>
    %55 = arith.mulf %50, %54 : vector<8x16x128xf32>
    %56 = arith.addf %48, %55 : vector<8x16x128xf32>
    %c1_31 = arith.constant 1 : index
    %c0_32 = arith.constant 0 : index
    %c0_33 = arith.constant 0 : index
    %57 = vector.load %arg13[%c1_31, %c0_32, %c0_33] : memref<10x24x128xbf16, #tpu.memory_space<vmem>>, vector<8x16x128xbf16>
    %58 = arith.extf %57 : vector<8x16x128xbf16> to vector<8x16x128xf32>
    %59 = vector.extract_strided_slice %31 {offsets = [3, 0], sizes = [1, 128], strides = [1, 1]} : vector<9x128xf32> to vector<1x128xf32>
    %60 = vector.shape_cast %59 : vector<1x128xf32> to vector<128xf32>
    %61 = vector.shape_cast %60 : vector<128xf32> to vector<1x1x128xf32>
    %62 = vector.broadcast %61 : vector<1x1x128xf32> to vector<8x16x128xf32>
    %63 = arith.mulf %58, %62 : vector<8x16x128xf32>
    %64 = arith.addf %56, %63 : vector<8x16x128xf32>
    %c1_34 = arith.constant 1 : index
    %c1_35 = arith.constant 1 : index
    %c0_36 = arith.constant 0 : index
    %65 = vector.load %arg13[%c1_34, %c1_35, %c0_36] : memref<10x24x128xbf16, #tpu.memory_space<vmem>>, vector<8x16x128xbf16>
    %66 = arith.extf %65 : vector<8x16x128xbf16> to vector<8x16x128xf32>
    %67 = vector.extract_strided_slice %31 {offsets = [4, 0], sizes = [1, 128], strides = [1, 1]} : vector<9x128xf32> to vector<1x128xf32>
    %68 = vector.shape_cast %67 : vector<1x128xf32> to vector<128xf32>
    %69 = vector.shape_cast %68 : vector<128xf32> to vector<1x1x128xf32>
    %70 = vector.broadcast %69 : vector<1x1x128xf32> to vector<8x16x128xf32>
    %71 = arith.mulf %66, %70 : vector<8x16x128xf32>
    %72 = arith.addf %64, %71 : vector<8x16x128xf32>
    %c1_37 = arith.constant 1 : index
    %c2_38 = arith.constant 2 : index
    %c0_39 = arith.constant 0 : index
    %73 = vector.load %arg13[%c1_37, %c2_38, %c0_39] : memref<10x24x128xbf16, #tpu.memory_space<vmem>>, vector<8x16x128xbf16>
    %74 = arith.extf %73 : vector<8x16x128xbf16> to vector<8x16x128xf32>
    %75 = vector.extract_strided_slice %31 {offsets = [5, 0], sizes = [1, 128], strides = [1, 1]} : vector<9x128xf32> to vector<1x128xf32>
    %76 = vector.shape_cast %75 : vector<1x128xf32> to vector<128xf32>
    %77 = vector.shape_cast %76 : vector<128xf32> to vector<1x1x128xf32>
    %78 = vector.broadcast %77 : vector<1x1x128xf32> to vector<8x16x128xf32>
    %79 = arith.mulf %74, %78 : vector<8x16x128xf32>
    %80 = arith.addf %72, %79 : vector<8x16x128xf32>
    %c2_40 = arith.constant 2 : index
    %c0_41 = arith.constant 0 : index
    %c0_42 = arith.constant 0 : index
    %81 = vector.load %arg13[%c2_40, %c0_41, %c0_42] : memref<10x24x128xbf16, #tpu.memory_space<vmem>>, vector<8x16x128xbf16>
    %82 = arith.extf %81 : vector<8x16x128xbf16> to vector<8x16x128xf32>
    %83 = vector.extract_strided_slice %31 {offsets = [6, 0], sizes = [1, 128], strides = [1, 1]} : vector<9x128xf32> to vector<1x128xf32>
    %84 = vector.shape_cast %83 : vector<1x128xf32> to vector<128xf32>
    %85 = vector.shape_cast %84 : vector<128xf32> to vector<1x1x128xf32>
    %86 = vector.broadcast %85 : vector<1x1x128xf32> to vector<8x16x128xf32>
    %87 = arith.mulf %82, %86 : vector<8x16x128xf32>
    %88 = arith.addf %80, %87 : vector<8x16x128xf32>
    %c2_43 = arith.constant 2 : index
    %c1_44 = arith.constant 1 : index
    %c0_45 = arith.constant 0 : index
    %89 = vector.load %arg13[%c2_43, %c1_44, %c0_45] : memref<10x24x128xbf16, #tpu.memory_space<vmem>>, vector<8x16x128xbf16>
    %90 = arith.extf %89 : vector<8x16x128xbf16> to vector<8x16x128xf32>
    %91 = vector.extract_strided_slice %31 {offsets = [7, 0], sizes = [1, 128], strides = [1, 1]} : vector<9x128xf32> to vector<1x128xf32>
    %92 = vector.shape_cast %91 : vector<1x128xf32> to vector<128xf32>
    %93 = vector.shape_cast %92 : vector<128xf32> to vector<1x1x128xf32>
    %94 = vector.broadcast %93 : vector<1x1x128xf32> to vector<8x16x128xf32>
    %95 = arith.mulf %90, %94 : vector<8x16x128xf32>
    %96 = arith.addf %88, %95 : vector<8x16x128xf32>
    %c2_46 = arith.constant 2 : index
    %c2_47 = arith.constant 2 : index
    %c0_48 = arith.constant 0 : index
    %97 = vector.load %arg13[%c2_46, %c2_47, %c0_48] : memref<10x24x128xbf16, #tpu.memory_space<vmem>>, vector<8x16x128xbf16>
    %98 = arith.extf %97 : vector<8x16x128xbf16> to vector<8x16x128xf32>
    %99 = vector.extract_strided_slice %31 {offsets = [8, 0], sizes = [1, 128], strides = [1, 1]} : vector<9x128xf32> to vector<1x128xf32>
    %100 = vector.shape_cast %99 : vector<1x128xf32> to vector<128xf32>
    %101 = vector.shape_cast %100 : vector<128xf32> to vector<1x1x128xf32>
    %102 = vector.broadcast %101 : vector<1x1x128xf32> to vector<8x16x128xf32>
    %103 = arith.mulf %98, %102 : vector<8x16x128xf32>
    %104 = arith.addf %96, %103 : vector<8x16x128xf32>
    %c0_49 = arith.constant 0 : index
    %c0_50 = arith.constant 0 : index
    %105 = vector.load %arg7[%c0_49, %c0_50] : memref<1x128xf32, #tpu.memory_space<vmem>>, vector<1x128xf32>
    %106 = vector.shape_cast %105 : vector<1x128xf32> to vector<1x1x128xf32>
    %107 = vector.broadcast %106 : vector<1x1x128xf32> to vector<8x16x128xf32>
    %108 = arith.mulf %104, %107 : vector<8x16x128xf32>
    %c0_51 = arith.constant 0 : index
    %c0_52 = arith.constant 0 : index
    %109 = vector.load %arg8[%c0_51, %c0_52] : memref<1x128xf32, #tpu.memory_space<vmem>>, vector<1x128xf32>
    %110 = vector.shape_cast %109 : vector<1x128xf32> to vector<1x1x128xf32>
    %111 = vector.broadcast %110 : vector<1x1x128xf32> to vector<8x16x128xf32>
    %112 = arith.addf %108, %111 : vector<8x16x128xf32>
    %cst_53 = arith.constant 0.000000e+00 : f32
    %cst_54 = arith.constant 6.000000e+00 : f32
    %113 = vector.broadcast %cst_53 : f32 to vector<8x16x128xf32>
    %114 = arith.maximumf %113, %112 : vector<8x16x128xf32>
    %115 = vector.broadcast %cst_54 : f32 to vector<8x16x128xf32>
    %116 = arith.minimumf %115, %114 : vector<8x16x128xf32>
    %117 = arith.truncf %116 : vector<8x16x128xf32> to vector<8x16x128xbf16>
    %118 = vector.shape_cast %117 : vector<8x16x128xbf16> to vector<128x128xbf16>
    %c0_55 = arith.constant 0 : index
    %c0_56 = arith.constant 0 : index
    %119 = vector.load %arg9[%c0_55, %c0_56] : memref<128x128xbf16, #tpu.memory_space<vmem>>, vector<128x128xbf16>
    %cst_57 = arith.constant dense<0.000000e+00> : vector<128x128xf32>
    %120 = tpu.matmul %118, %119, %cst_57 {dimension_numbers = #tpu.dot_dimension_numbers<[1], [0], [0], [1], [0, 0, 1, 1], [], []>} : vector<128x128xbf16>, vector<128x128xbf16>, vector<128x128xf32> -> vector<128x128xf32>
    %c0_58 = arith.constant 0 : index
    %c0_59 = arith.constant 0 : index
    %121 = vector.load %arg10[%c0_58, %c0_59] : memref<1x128xf32, #tpu.memory_space<vmem>>, vector<1x128xf32>
    %122 = vector.broadcast %121 : vector<1x128xf32> to vector<128x128xf32>
    %123 = arith.mulf %120, %122 : vector<128x128xf32>
    %c0_60 = arith.constant 0 : index
    %c0_61 = arith.constant 0 : index
    %124 = vector.load %arg11[%c0_60, %c0_61] : memref<1x128xf32, #tpu.memory_space<vmem>>, vector<1x128xf32>
    %125 = vector.broadcast %124 : vector<1x128xf32> to vector<128x128xf32>
    %126 = arith.addf %123, %125 : vector<128x128xf32>
    %127 = tpu.transpose %126, [1, 0] : vector<128x128xf32> -> vector<128x128xf32>
    %c0_62 = arith.constant 0 : index
    %c0_63 = arith.constant 0 : index
    %c0_64 = arith.constant 0 : index
    %128 = vector.load %arg12[%c0_62, %c0_63, %c0_64] : memref<1x128x128xf32, #tpu.memory_space<vmem>>, vector<1x128x128xf32>
    %129 = vector.shape_cast %128 : vector<1x128x128xf32> to vector<128x128xf32>
    %130 = vector.shape_cast %127 : vector<128x128xf32> to vector<1x128x128xf32>
    tpu.vector_store %arg12[%c0_62, %c0_63, %c0_64], %130 {strides = array<i32>} : memref<1x128x128xf32, #tpu.memory_space<vmem>>, vector<1x128x128xf32>,
    return
  }
  func.func @transform_0(%arg0: i32, %arg1: i32) -> (i32, i32, i32) {
    %c0_i32 = arith.constant 0 : i32
    %c0_i32_0 = arith.constant 0 : i32
    %c0_i32_1 = arith.constant 0 : i32
    return %arg0, %c0_i32, %c0_i32_0 : i32, i32, i32
  }
  func.func @transform_1(%arg0: i32, %arg1: i32) -> (i32, i32) {
    %c0_i32 = arith.constant 0 : i32
    %c0_i32_0 = arith.constant 0 : i32
    %c0_i32_1 = arith.constant 0 : i32
    return %c0_i32, %c0_i32_0 : i32, i32
  }
  func.func @transform_2(%arg0: i32, %arg1: i32) -> (i32, i32) {
    %c0_i32 = arith.constant 0 : i32
    %c0_i32_0 = arith.constant 0 : i32
    %c0_i32_1 = arith.constant 0 : i32
    return %c0_i32, %c0_i32_0 : i32, i32
  }
  func.func @transform_3(%arg0: i32, %arg1: i32) -> (i32, i32) {
    %c0_i32 = arith.constant 0 : i32
    %c0_i32_0 = arith.constant 0 : i32
    %c0_i32_1 = arith.constant 0 : i32
    return %c0_i32, %c0_i32_0 : i32, i32
  }
  func.func @transform_4(%arg0: i32, %arg1: i32) -> (i32, i32) {
    %c0_i32 = arith.constant 0 : i32
    %c0_i32_0 = arith.constant 0 : i32
    %c0_i32_1 = arith.constant 0 : i32
    return %c0_i32, %c0_i32_0 : i32, i32
  }
  func.func @transform_5(%arg0: i32, %arg1: i32) -> (i32, i32) {
    %c0_i32 = arith.constant 0 : i32
    %c0_i32_0 = arith.constant 0 : i32
    %c0_i32_1 = arith.constant 0 : i32
    return %c0_i32, %c0_i32_0 : i32, i32
  }
  func.func @transform_6(%arg0: i32, %arg1: i32) -> (i32, i32) {
    %c0_i32 = arith.constant 0 : i32
    %c0_i32_0 = arith.constant 0 : i32
    %c0_i32_1 = arith.constant 0 : i32
    return %c0_i32, %c0_i32_0 : i32, i32
  }
  func.func @transform_7(%arg0: i32, %arg1: i32) -> (i32, i32) {
    %c0_i32 = arith.constant 0 : i32
    %c0_i32_0 = arith.constant 0 : i32
    %c0_i32_1 = arith.constant 0 : i32
    return %c0_i32, %c0_i32_0 : i32, i32
  }
  func.func @transform_8(%arg0: i32, %arg1: i32) -> (i32, i32) {
    %c0_i32 = arith.constant 0 : i32
    %c0_i32_0 = arith.constant 0 : i32
    %c0_i32_1 = arith.constant 0 : i32
    return %c0_i32, %c0_i32_0 : i32, i32
  }
  func.func @transform_9(%arg0: i32, %arg1: i32) -> (i32, i32) {
    %c0_i32 = arith.constant 0 : i32
    %c0_i32_0 = arith.constant 0 : i32
    %c0_i32_1 = arith.constant 0 : i32
    return %c0_i32, %c0_i32_0 : i32, i32
  }
  func.func @transform_10(%arg0: i32, %arg1: i32) -> (i32, i32, i32) {
    %c0_i32 = arith.constant 0 : i32
    %c0_i32_0 = arith.constant 0 : i32
    return %arg0, %c0_i32, %arg1 : i32, i32, i32
  }
}

</mosaic_0001>

<bundles_post_ra>
// kernel: tpu_custom_call.1
= control target key start
LH: loop header
LB: loop body
LE: loop exit
PB: predicated region body
PF: predicated region fallthrough
CT: control target
= control target key end

     0   :  { %s3687_s0 = inlined_call_operand.vmem [shape: bf16[2,432,4], index: 0, kind: input, shape index: {}]   ;;  %s3688_s1 = inlined_call_operand.vmem [shape: bf16[4,128], index: 1, kind: input, shape index: {}]   ;;  %s3689_s2 = inlined_call_operand.vmem [shape: f32[1,128], index: 2, kind: input, shape index: {}]   ;;  %s3690_s3 = inlined_call_operand.vmem [shape: f32[1,128], index: 3, kind: input, shape index: {}]   ;;  %s3691_s4 = inlined_call_operand.vmem [shape: f32[9,128], index: 4, kind: input, shape index: {}]   ;;  %s3692_s5 = inlined_call_operand.vmem [shape: f32[1,128], index: 5, kind: input, shape index: {}]   ;;  %s3693_s6 = inlined_call_operand.vmem [shape: f32[1,128], index: 6, kind: input, shape index: {}]   ;;  %s3694_s7 = inlined_call_operand.vmem [shape: bf16[128,128], index: 7, kind: input, shape index: {}]   ;;  %s3695_s8 = inlined_call_operand.vmem [shape: f32[1,128], index: 8, kind: input, shape index: {}]   ;;  %s3696_s9 = inlined_call_operand.vmem [shape: f32[1,128], index: 9, kind: input, shape index: {}]   ;;  %s3697_s10 = inlined_call_operand.hbm [shape: f32[2,128,256], index: 10, kind: output, shape index: {}]  }
   0x1   :  { %3702 = sst [smem:[#allocation10_spill]] %s3687_s0 }
   0x2   :  { %15 = vsyncpa [#allocation4], 0 }
   0x3   :  { %17 = vsyncpa [#allocation4 + $0x1], 0  ;;  %s2884_s13 = smov 0   ;;  %s2886_s14 = smov 0  }
   0x4   :  { %s2888_s15 = smov 0   ;;  %s2890_s16 = smov 0  }
   0x5   :  { %s2892_s17 = smov 0   ;;  %s2894_s18 = smov 0  }
   0x6   :  { %s2896_s19 = smov 0   ;;  %s2898_s20 = smov 0  }
   0x7 LB: > { %3703 = sst [smem:[#allocation6_spill]] %s2814_s18  ;;  %s2340_s21 = sadd.s32 4294967295, %s2822_s20   ;;  %s2822_s20 = sphi %s2898_s20, %s23_s20   ;;  %s2818_s19 = sphi %s2896_s19, %s3717_s19   ;;  %s2814_s18 = sphi %s2894_s18, %s3716_s18   ;;  %s2810_s17 = sphi %s2892_s17, %s3715_s17   ;;  %s2806_s16 = sphi %s2890_s16, %s3714_s16   ;;  %s2802_s15 = sphi %s2888_s15, %s3720_s15   ;;  %s2798_s14 = sphi %s2886_s14, %s3719_s14   ;;  %s2794_s13 = sphi %s2884_s13, %s3718_s13  }
   0x8   : > { %3704 = sst [smem:[#allocation7_spill]] %s2818_s19  ;;  %s2341_s22 = sadd.s32 4294967294, %s2822_s20  }
   0x9   : > { %s32_s23 = sadd.s32 1, %s2814_s18  ;;  %s35_s24 = sadd.s32 1, %s2818_s19 }
   0xa   : > { %p33_p0 = scmp.ge.s32.totalorder %s32_s23, 2  ;;  %p269_p1 = scmp.ne.s32.totalorder %s2802_s15, %s2798_s14 }
   0xb   : > { %p270_p2 = scmp.eq.s32.totalorder %s2340_s21, 3  ;;  %p275_p5 = scmp.ne.s32.totalorder %s2798_s14, %s2794_s13 }
   0xc   : > { %s3722_s23 = smov (%p33_p0, %s32_s23), 0  ;;  %s3724_s24 = smov (!%p33_p0, %s35_s24), %s2818_s19 }
   0xd   : > { %3705 = sst [smem:[#allocation8_spill]] %s3722_s23  ;;  %s255_s25 = ssub.s32 %s2814_s18, %s3722_s23 }
   0xe   : > { %p2935_p3 = por %p270_p2, %p269_p1  ;;  %p37_p4 = scmp.ge.s32.totalorder %s3724_s24, 2 }
   0xf   : > { %p276_p6 = scmp.eq.s32.totalorder %s2341_s22, 3  ;;  %p2344_p7 = scmp.ge.s32.totalorder %s2822_s20, 1 }
  0x10   : > { %s3726_s24 = smov (%p37_p4, %s3724_s24), 0  ;;  %p329_p9 = scmp.lt.s32.totalorder %s2822_s20, 5 }
  0x11   : > { %3707 = sst [smem:[#allocation9_spill]] %s3726_s24  ;;  %p2944_p8 = por %p276_p6, %p275_p5 }
  0x12   : > { %s254_s28 = ssub.s32 %s2818_s19, %s3726_s24  ;;  %s259_s29 = sadd.s32 1, %s2802_s15 }
  0x13   : > { %s256_s30 = sor.u32 %s255_s25, %s254_s28  ;;  %p330_p10 = pnand %p2344_p7, %p329_p9 }
  0x14   : > { %p257_p11 = scmp.eq.s32.totalorder %s256_s30, 0  ;;  %p367_p12 = scmp.lt.s32.totalorder (!%p330_p10), %s2810_s17, 1 }
  0x15   : > { %333 = sbr.rel (%p330_p10) target bundleno = 838 (0x346), region = 60  ;;  %s364_s24 = sand.u32 (!%p330_p10), 1, %s2798_s14  }
  0x16   : > { %s2953_s11 = scalar_select %p257_p11, %s2802_s15, %s259_s29  }
  0x17   : > { %s373_s22 = smul.u32 (!%p330_p10), 192, %s2806_s16  ;;  %s2964_s29 = sshll.u32 (!%p330_p10), %s364_s24, 7 }
  0x18   : > { %s3709_s0 = sld [smem:[#allocation10_spill]] (!%p330_p10)  ;;  %p2423_p13 = scmp.ne.s32.totalorder (!%p330_p10), %s2806_s16, 0 }
  0x19   : > { %s374_s28 = sshra.s32 (!%p330_p10), %s373_s22, 3 }
  0x1a   : > { %v408_v0 = vld [vmem:[%s3688_s1] sm:$0x3]  ;;  %vm530_vm0 = vcmask 1041408   ;;  %s368_s25 = scalar_select %p367_p12, %s2810_s17, 1  ;;  %vm484_vm1 = vcmask 31744   ;;  %vm806_vm2 = vcmask 1040384  }
  0x1b   : > { %v532_v1 = vsel %vm530_vm0, %v408_v0, 0  ;;  %s2347_s12 = sshll.u32 %s374_s28, 2  ;;  %v2987_v17 = vld [vmem:[%s3689_s2] ss:$0 sm:$0xff]  ;;  %vm807_vm3 = vsmask.f32 256 }
  0x1c   : > { %2632 = vmatpush.bf16.msra.mxu2 %v532_v1  ;;  %541 = vmatpush.bf16.msra.mxu0 %v532_v1  ;;  %s2641_s30 = smul.u32 216, %s368_s25  ;;  %v2993_v20 = vld [vmem:[%s3690_s3] ss:$0 sm:$0xff]  ;;  %vm3007_vm4 = vmand %vm806_vm2, %vm807_vm3  ;;  %vm839_vm5 = vsmask.f32 7938 }
  0x1d   : > { %vm3016_vm6 = vmand %vm806_vm2, %vm839_vm5 }
  0x1e   : > { %s371_s19 = scalar_lea.vmem %s3709_s0, %s2641_s30 }
  0x1f   : > { %s377_s18 = scalar_lea.vmem %s371_s19, %s2347_s12 }
  0x20   : > { %v2469_v2 = vld [vmem:[%s377_s18 + $0x38] sm:$0xff]  ;;  %v2462_v3 = vld [vmem:[%s377_s18] sm:$0xff]  ;;  %v2463_v5 = vld [vmem:[%s377_s18 + $0x8] sm:$0xff] }
  0x21   : > { %2415 = vmatmul.msk.bf16.vlgmr.msra.gmra.mxu2 %vm484_vm1, %v2469_v2  ;;  %2408 = vmatmul.msk.bf16.vlgmr.msra.gmra.mxu0 %vm484_vm1, %v2462_v3  ;;  %v2470_v4 = vld [vmem:[%s377_s18 + $0x40] sm:$0xff]  ;;  %v2471_v6 = vld [vmem:[%s377_s18 + $0x48] sm:$0xff]  ;;  %v2464_v7 = vld [vmem:[%s377_s18 + $0x10] sm:$0xff] }
  0x22   : > { %v2472_v8 = vld [vmem:[%s377_s18 + $0x50] sm:$0xff]  ;;  %v2465_v9 = vld [vmem:[%s377_s18 + $0x18] sm:$0xff]  ;;  %v2466_v11 = vld [vmem:[%s377_s18 + $0x20] sm:$0xff] }
  0x23   : > { %v2473_v10 = vld [vmem:[%s377_s18 + $0x58] sm:$0xff]  ;;  %v2474_v12 = vld [vmem:[%s377_s18 + $0x60] sm:$0xff]  ;;  %v2467_v13 = vld [vmem:[%s377_s18 + $0x28] sm:$0xff] }
  0x24   : > { %v2475_v14 = vld [vmem:[%s377_s18 + $0x68] sm:$0xff]  ;;  %v2468_v15 = vld [vmem:[%s377_s18 + $0x30] sm:$0xff] }
  0x25   : > { %v2476_v16 = vld [vmem:[%s377_s18 + $0x70] sm:$0xff]  ;;  %s3105_s18 = scalar_lea.vmem [#allocation3], %s2964_s29 }
  0x31   : > { %2416 = vmatmul.msk.bf16.gmra.mxu2 %vm484_vm1, %v2470_v4  ;;  %2409 = vmatmul.msk.bf16.gmra.mxu0 %vm484_vm1, %v2463_v5 }
  0x41   : > { %2417 = vmatmul.msk.bf16.gmra.mxu2 %vm484_vm1, %v2471_v6  ;;  %2410 = vmatmul.msk.bf16.gmra.mxu0 %vm484_vm1, %v2464_v7 }
  0x51   : > { %2418 = vmatmul.msk.bf16.gmra.mxu2 %vm484_vm1, %v2472_v8  ;;  %2411 = vmatmul.msk.bf16.gmra.mxu0 %vm484_vm1, %v2465_v9 }
  0x61   : > { %2419 = vmatmul.msk.bf16.gmra.mxu2 %vm484_vm1, %v2473_v10  ;;  %2412 = vmatmul.msk.bf16.gmra.mxu0 %vm484_vm1, %v2466_v11 }
  0x71   : > { %2420 = vmatmul.msk.bf16.gmra.mxu2 %vm484_vm1, %v2474_v12  ;;  %2413 = vmatmul.msk.bf16.gmra.mxu0 %vm484_vm1, %v2467_v13 }
  0x81   : > { %2421 = vmatmul.msk.bf16.gmra.mxu2 %vm484_vm1, %v2475_v14  ;;  %2414 = vmatmul.msk.bf16.gmra.mxu0 %vm484_vm1, %v2468_v15 }
  0x91   : > { %2422 = vmatmul.msk.bf16.gmra.mxu2 %vm484_vm1, %v2476_v16 }
  0x9e   : > { %v543_v18 = vpop.f32.mrf.mxu0 }
  0x9f   : > { %v622_v19 = vmul.f32 %v2987_v17, %v543_v18 }
  0xa1   : > { %v656_v21 = vadd.f32 %v2993_v20, %v622_v19 }
  0xa3   : > { %v686_v25 = vmax.f32 %v656_v21, 0.0 }
  0xa4   : > { %v578_v22 = vpop.f32.mrf.mxu2 }
  0xa5   : > { %v636_v24 = vmul.f32 %v2987_v17, %v578_v22  ;;  %v716_v29 = vmin.f32 %v686_v25, 6.0 }
  0xa6   : > { %v545_v23 = vpop.f32.mrf.mxu0 }
  0xa7   : > { %v623_v26 = vmul.f32 %v2987_v17, %v545_v23  ;;  %v670_v28 = vadd.f32 %v2993_v20, %v636_v24 }
  0xa9   : > { %v657_v27 = vadd.f32 %v2993_v20, %v623_v26  ;;  %v700_v35 = vmax.f32 %v670_v28, 0.0 }
  0xab   : > { %v687_v30 = vmax.f32 %v657_v27, 0.0  ;;  %v730_v40 = vmin.f32 %v700_v35, 6.0 }
  0xac   : > { %v580_v31 = vpop.f32.mrf.mxu2 }
  0xad   : > { %v637_v32 = vmul.f32 %v2987_v17, %v580_v31  ;;  %v717_v33 = vmin.f32 %v687_v30, 6.0 }
  0xae   : > { %v548_v34 = vpop.f32.mrf.mxu0 }
  0xaf   : > { %v671_v36 = vadd.f32 %v2993_v20, %v637_v32  ;;  %v2488_v37 = vpack.c.bf16 %v717_v33, %v716_v29  ;;  %v624_v38 = vmul.f32 %v2987_v17, %v548_v34 }
  0xb1   : > { %v701_v39 = vmax.f32 %v671_v36, 0.0  ;;  %2489 = vst [vmem:[#allocation2] sm:$0xff] %v2488_v37   ;;  %v658_v42 = vadd.f32 %v2993_v20, %v624_v38 }
  0xb3   : > { %v731_v41 = vmin.f32 %v701_v39, 6.0  ;;  %v688_v47 = vmax.f32 %v658_v42, 0.0 }
  0xb4   : > { %v583_v43 = vpop.f32.mrf.mxu2 }
  0xb5   : > { %v2523_v44 = vpack.c.bf16 %v731_v41, %v730_v40  ;;  %v638_v45 = vmul.f32 %v2987_v17, %v583_v43  ;;  %v718_v54 = vmin.f32 %v688_v47, 6.0 }
  0xb6   : > { %v550_v46 = vpop.f32.mrf.mxu0 }
  0xb7   : > { %2614 = vst [vmem:[#allocation2 + $0x38] sm:$0xff] %v2523_v44   ;;  %v625_v48 = vmul.f32 %v2987_v17, %v550_v46  ;;  %v672_v53 = vadd.f32 %v2993_v20, %v638_v45 }
  0xb8   : > { %v809_v50 = vld [vmem:[#allocation2] sm:$0x1] }
  0xb9   : > { %v810_v51 = vsel %vm3007_vm4, 0, %v809_v50  ;;  %v659_v52 = vadd.f32 %v2993_v20, %v625_v48  ;;  %v702_v62 = vmax.f32 %v672_v53, 0.0 }
  0xba   : > { %811 = vst [vmem:[#allocation2] sm:$0x1] %v810_v51 }
  0xbb   : > { %v689_v55 = vmax.f32 %v659_v52, 0.0  ;;  %v732_v6 = vmin.f32 %v702_v62, 6.0 }
  0xbc   : > { %v585_v57 = vpop.f32.mrf.mxu2 }
  0xbd   : > { %v639_v58 = vmul.f32 %v2987_v17, %v585_v57  ;;  %v719_v59 = vmin.f32 %v689_v55, 6.0 }
  0xbe   : > { %v824_v60 = vld [vmem:[#allocation2 + $0x3c] sm:$0x1]  ;;  %v853_v61 = vld [vmem:[#allocation2 + $0x38] sm:$0x1]  ;;  %v553_v63 = vpop.f32.mrf.mxu0 }
  0xbf   : > { %v825_v0 = vsel %vm3007_vm4, 0, %v824_v60  ;;  %v854_v1 = vsel %vm3016_vm6, 0, %v853_v61  ;;  %v673_v2 = vadd.f32 %v2993_v20, %v639_v58  ;;  %v2493_v3 = vpack.c.bf16 %v719_v59, %v718_v54 }
  0xc0   : > { %826 = vst [vmem:[#allocation2 + $0x3c] sm:$0x1] %v825_v0  ;;  %v626_v4 = vmul.f32 %v2987_v17, %v553_v63 }
  0xc1   : > { %855 = vst [vmem:[#allocation2 + $0x38] sm:$0x1] %v854_v1  ;;  %v703_v5 = vmax.f32 %v673_v2, 0.0 }
  0xc2   : > { %2608 = vst [vmem:[#allocation2 + $0x8] sm:$0xff] %v2493_v3   ;;  %v660_v8 = vadd.f32 %v2993_v20, %v626_v4 }
  0xc3   : > { %v733_v7 = vmin.f32 %v703_v5, 6.0 }
  0xc4   : > { %v588_v9 = vpop.f32.mrf.mxu2  ;;  %v690_v13 = vmax.f32 %v660_v8, 0.0 }
  0xc5   : > { %v2528_v10 = vpack.c.bf16 %v733_v7, %v732_v6  ;;  %v640_v11 = vmul.f32 %v2987_v17, %v588_v9 }
  0xc6   : > { %v555_v12 = vpop.f32.mrf.mxu0  ;;  %v720_v23 = vmin.f32 %v690_v13, 6.0 }
  0xc7   : > { %2615 = vst [vmem:[#allocation2 + $0x40] sm:$0xff] %v2528_v10   ;;  %v627_v14 = vmul.f32 %v2987_v17, %v555_v12  ;;  %v674_v22 = vadd.f32 %v2993_v20, %v640_v11 }
  0xc9   : > { %v812_v15 = vld [vmem:[#allocation2 + $0xc] sm:$0x1]  ;;  %v841_v16 = vld [vmem:[#allocation2 + $0x8] sm:$0x1]  ;;  %v661_v18 = vadd.f32 %v2993_v20, %v627_v14  ;;  %v704_v29 = vmax.f32 %v674_v22, 0.0 }
  0xca   : > { %v813_v19 = vsel %vm3007_vm4, 0, %v812_v15  ;;  %v842_v21 = vsel %vm3016_vm6, 0, %v841_v16 }
  0xcb   : > { %814 = vst [vmem:[#allocation2 + $0xc] sm:$0x1] %v813_v19  ;;  %v691_v24 = vmax.f32 %v661_v18, 0.0  ;;  %v734_v36 = vmin.f32 %v704_v29, 6.0 }
  0xcc   : > { %843 = vst [vmem:[#allocation2 + $0x8] sm:$0x1] %v842_v21  ;;  %v590_v25 = vpop.f32.mrf.mxu2 }
  0xcd   : > { %v641_v26 = vmul.f32 %v2987_v17, %v590_v25  ;;  %v721_v27 = vmin.f32 %v691_v24, 6.0 }
  0xce   : > { %v856_v28 = vld [vmem:[#allocation2 + $0x44] sm:$0x1]  ;;  %v558_v30 = vpop.f32.mrf.mxu0 }
  0xcf   : > { %v857_v31 = vsel %vm3016_vm6, 0, %v856_v28  ;;  %v675_v32 = vadd.f32 %v2993_v20, %v641_v26  ;;  %v2498_v33 = vpack.c.bf16 %v721_v27, %v720_v23  ;;  %v628_v34 = vmul.f32 %v2987_v17, %v558_v30 }
  0xd0   : > { %858 = vst [vmem:[#allocation2 + $0x44] sm:$0x1] %v857_v31 }
  0xd1   : > { %v705_v35 = vmax.f32 %v675_v32, 0.0  ;;  %2609 = vst [vmem:[#allocation2 + $0x10] sm:$0xff] %v2498_v33   ;;  %v662_v38 = vadd.f32 %v2993_v20, %v628_v34 }
  0xd3   : > { %v735_v37 = vmin.f32 %v705_v35, 6.0  ;;  %v692_v43 = vmax.f32 %v662_v38, 0.0 }
  0xd4   : > { %v593_v39 = vpop.f32.mrf.mxu2 }
  0xd5   : > { %v2533_v40 = vpack.c.bf16 %v735_v37, %v734_v36  ;;  %v642_v41 = vmul.f32 %v2987_v17, %v593_v39  ;;  %v722_v50 = vmin.f32 %v692_v43, 6.0 }
  0xd6   : > { %v560_v42 = vpop.f32.mrf.mxu0 }
  0xd7   : > { %2616 = vst [vmem:[#allocation2 + $0x48] sm:$0xff] %v2533_v40   ;;  %v629_v44 = vmul.f32 %v2987_v17, %v560_v42  ;;  %v676_v48 = vadd.f32 %v2993_v20, %v642_v41 }
  0xd8   : > { %v844_v45 = vld [vmem:[#allocation2 + $0x14] sm:$0x1] }
  0xd9   : > { %v845_v46 = vsel %vm3016_vm6, 0, %v844_v45  ;;  %v663_v47 = vadd.f32 %v2993_v20, %v629_v44  ;;  %v706_v57 = vmax.f32 %v676_v48, 0.0 }
  0xda   : > { %846 = vst [vmem:[#allocation2 + $0x14] sm:$0x1] %v845_v46 }
  0xdb   : > { %v693_v51 = vmax.f32 %v663_v47, 0.0  ;;  %v736_v0 = vmin.f32 %v706_v57, 6.0 }
  0xdc   : > { %v595_v52 = vpop.f32.mrf.mxu2 }
  0xdd   : > { %v643_v53 = vmul.f32 %v2987_v17, %v595_v52  ;;  %v723_v54 = vmin.f32 %v693_v51, 6.0 }
  0xde   : > { %v827_v55 = vld [vmem:[#allocation2 + $0x48] sm:$0x1]  ;;  %v563_v58 = vpop.f32.mrf.mxu0 }
  0xdf   : > { %v828_v59 = vsel %vm3007_vm4, 0, %v827_v55  ;;  %v677_v60 = vadd.f32 %v2993_v20, %v643_v53  ;;  %v2503_v61 = vpack.c.bf16 %v723_v54, %v722_v50  ;;  %v630_v62 = vmul.f32 %v2987_v17, %v563_v58 }
  0xe0   : > { %829 = vst [vmem:[#allocation2 + $0x48] sm:$0x1] %v828_v59 }
  0xe1   : > { %v707_v63 = vmax.f32 %v677_v60, 0.0  ;;  %2610 = vst [vmem:[#allocation2 + $0x18] sm:$0xff] %v2503_v61   ;;  %v664_v2 = vadd.f32 %v2993_v20, %v630_v62 }
  0xe3   : > { %v737_v1 = vmin.f32 %v707_v63, 6.0  ;;  %v694_v7 = vmax.f32 %v664_v2, 0.0 }
  0xe4   : > { %v598_v3 = vpop.f32.mrf.mxu2 }
  0xe5   : > { %v2538_v4 = vpack.c.bf16 %v737_v1, %v736_v0  ;;  %v644_v5 = vmul.f32 %v2987_v17, %v598_v3  ;;  %v724_v13 = vmin.f32 %v694_v7, 6.0 }
  0xe6   : > { %v565_v6 = vpop.f32.mrf.mxu0 }
  0xe7   : > { %2617 = vst [vmem:[#allocation2 + $0x50] sm:$0xff] %v2538_v4   ;;  %v631_v8 = vmul.f32 %v2987_v17, %v565_v6  ;;  %v678_v12 = vadd.f32 %v2993_v20, %v644_v5 }
  0xe8   : > { %v815_v9 = vld [vmem:[#allocation2 + $0x18] sm:$0x1] }
  0xe9   : > { %v816_v10 = vsel %vm3007_vm4, 0, %v815_v9  ;;  %v665_v11 = vadd.f32 %v2993_v20, %v631_v8  ;;  %v708_v22 = vmax.f32 %v678_v12, 0.0 }
  0xea   : > { %817 = vst [vmem:[#allocation2 + $0x18] sm:$0x1] %v816_v10 }
  0xeb   : > { %v695_v14 = vmax.f32 %v665_v11, 0.0  ;;  %v738_v30 = vmin.f32 %v708_v22, 6.0 }
  0xec   : > { %v600_v15 = vpop.f32.mrf.mxu2 }
  0xed   : > { %v645_v16 = vmul.f32 %v2987_v17, %v600_v15  ;;  %v725_v18 = vmin.f32 %v695_v14, 6.0 }
  0xee   : > { %v830_v19 = vld [vmem:[#allocation2 + $0x54] sm:$0x1]  ;;  %v859_v21 = vld [vmem:[#allocation2 + $0x50] sm:$0x1]  ;;  %v568_v23 = vpop.f32.mrf.mxu0 }
  0xef   : > { %v831_v24 = vsel %vm3007_vm4, 0, %v830_v19  ;;  %v860_v25 = vsel %vm3016_vm6, 0, %v859_v21  ;;  %v679_v26 = vadd.f32 %v2993_v20, %v645_v16  ;;  %v2508_v27 = vpack.c.bf16 %v725_v18, %v724_v13 }
  0xf0   : > { %832 = vst [vmem:[#allocation2 + $0x54] sm:$0x1] %v831_v24  ;;  %v632_v28 = vmul.f32 %v2987_v17, %v568_v23 }
  0xf1   : > { %861 = vst [vmem:[#allocation2 + $0x50] sm:$0x1] %v860_v25  ;;  %v709_v29 = vmax.f32 %v679_v26, 0.0 }
  0xf2   : > { %2611 = vst [vmem:[#allocation2 + $0x20] sm:$0xff] %v2508_v27   ;;  %v666_v32 = vadd.f32 %v2993_v20, %v632_v28 }
  0xf3   : > { %v739_v31 = vmin.f32 %v709_v29, 6.0 }
  0xf4   : > { %v603_v33 = vpop.f32.mrf.mxu2  ;;  %v696_v37 = vmax.f32 %v666_v32, 0.0 }
  0xf5   : > { %v2543_v34 = vpack.c.bf16 %v739_v31, %v738_v30  ;;  %v646_v35 = vmul.f32 %v2987_v17, %v603_v33 }
  0xf6   : > { %v570_v36 = vpop.f32.mrf.mxu0  ;;  %v726_v45 = vmin.f32 %v696_v37, 6.0 }
  0xf7   : > { %2618 = vst [vmem:[#allocation2 + $0x58] sm:$0xff] %v2543_v34   ;;  %v633_v38 = vmul.f32 %v2987_v17, %v570_v36  ;;  %v680_v44 = vadd.f32 %v2993_v20, %v646_v35 }
  0xf9   : > { %v818_v39 = vld [vmem:[#allocation2 + $0x24] sm:$0x1]  ;;  %v847_v40 = vld [vmem:[#allocation2 + $0x20] sm:$0x1]  ;;  %v667_v41 = vadd.f32 %v2993_v20, %v633_v38  ;;  %v710_v52 = vmax.f32 %v680_v44, 0.0 }
  0xfa   : > { %v819_v42 = vsel %vm3007_vm4, 0, %v818_v39  ;;  %v848_v43 = vsel %vm3016_vm6, 0, %v847_v40 }
  0xfb   : > { %820 = vst [vmem:[#allocation2 + $0x24] sm:$0x1] %v819_v42  ;;  %v697_v46 = vmax.f32 %v667_v41, 0.0  ;;  %v740_v60 = vmin.f32 %v710_v52, 6.0 }
  0xfc   : > { %849 = vst [vmem:[#allocation2 + $0x20] sm:$0x1] %v848_v43  ;;  %v605_v47 = vpop.f32.mrf.mxu2 }
  0xfd   : > { %v647_v48 = vmul.f32 %v2987_v17, %v605_v47  ;;  %v727_v50 = vmin.f32 %v697_v46, 6.0 }
  0xfe   : > { %v862_v51 = vld [vmem:[#allocation2 + $0x5c] sm:$0x1]  ;;  %v573_v53 = vpop.f32.mrf.mxu0 }
  0xff   : > { %v863_v54 = vsel %vm3016_vm6, 0, %v862_v51  ;;  %v681_v55 = vadd.f32 %v2993_v20, %v647_v48  ;;  %v2513_v57 = vpack.c.bf16 %v727_v50, %v726_v45  ;;  %v634_v58 = vmul.f32 %v2987_v17, %v573_v53 }
 0x100   : > { %864 = vst [vmem:[#allocation2 + $0x5c] sm:$0x1] %v863_v54 }
 0x101   : > { %v711_v59 = vmax.f32 %v681_v55, 0.0  ;;  %2612 = vst [vmem:[#allocation2 + $0x28] sm:$0xff] %v2513_v57   ;;  %v668_v62 = vadd.f32 %v2993_v20, %v634_v58 }
 0x103   : > { %v741_v61 = vmin.f32 %v711_v59, 6.0  ;;  %v698_v3 = vmax.f32 %v668_v62, 0.0 }
 0x104   : > { %v608_v63 = vpop.f32.mrf.mxu2 }
 0x105   : > { %v2548_v0 = vpack.c.bf16 %v741_v61, %v740_v60  ;;  %v648_v2 = vmul.f32 %v2987_v17, %v608_v63  ;;  %v728_v9 = vmin.f32 %v698_v3, 6.0 }
 0x106   : > { %v575_v1 = vpop.f32.mrf.mxu0 }
 0x107   : > { %2619 = vst [vmem:[#allocation2 + $0x60] sm:$0xff] %v2548_v0   ;;  %v635_v4 = vmul.f32 %v2987_v17, %v575_v1  ;;  %v682_v8 = vadd.f32 %v2993_v20, %v648_v2 }
 0x108   : > { %v850_v5 = vld [vmem:[#allocation2 + $0x2c] sm:$0x1] }
 0x109   : > { %v851_v6 = vsel %vm3016_vm6, 0, %v850_v5  ;;  %v669_v7 = vadd.f32 %v2993_v20, %v635_v4  ;;  %v712_v16 = vmax.f32 %v682_v8, 0.0 }
 0x10a   : > { %852 = vst [vmem:[#allocation2 + $0x2c] sm:$0x1] %v851_v6 }
 0x10b   : > { %v699_v10 = vmax.f32 %v669_v7, 0.0  ;;  %v742_v22 = vmin.f32 %v712_v16, 6.0 }
 0x10c   : > { %v610_v11 = vpop.f32.mrf.mxu2 }
 0x10d   : > { %v649_v12 = vmul.f32 %v2987_v17, %v610_v11  ;;  %v729_v13 = vmin.f32 %v699_v10, 6.0 }
 0x10e   : > { %v833_v14 = vld [vmem:[#allocation2 + $0x60] sm:$0x1] }
 0x10f   : > { %v834_v15 = vsel %vm3007_vm4, 0, %v833_v14  ;;  %v683_v18 = vadd.f32 %v2993_v20, %v649_v12  ;;  %v2518_v19 = vpack.c.bf16 %v729_v13, %v728_v9 }
 0x110   : > { %835 = vst [vmem:[#allocation2 + $0x60] sm:$0x1] %v834_v15 }
 0x111   : > { %v713_v21 = vmax.f32 %v683_v18, 0.0  ;;  %2613 = vst [vmem:[#allocation2 + $0x30] sm:$0xff] %v2518_v19  }
 0x113   : > { %v743_v23 = vmin.f32 %v713_v21, 6.0 }
 0x114   : > { %v613_v24 = vpop.f32.mrf.mxu2 }
 0x115   : > { %v2553_v25 = vpack.c.bf16 %v743_v23, %v742_v22  ;;  %v650_v26 = vmul.f32 %v2987_v17, %v613_v24 }
 0x117   : > { %2620 = vst [vmem:[#allocation2 + $0x68] sm:$0xff] %v2553_v25   ;;  %v684_v29 = vadd.f32 %v2993_v20, %v650_v26 }
 0x118   : > { %v821_v27 = vld [vmem:[#allocation2 + $0x30] sm:$0x1] }
 0x119   : > { %v822_v28 = vsel %vm3007_vm4, 0, %v821_v27  ;;  %v714_v36 = vmax.f32 %v684_v29, 0.0 }
 0x11a   : > { %823 = vst [vmem:[#allocation2 + $0x30] sm:$0x1] %v822_v28 }
 0x11b   : > { %v744_v39 = vmin.f32 %v714_v36, 6.0 }
 0x11c   : > { %v615_v30 = vpop.f32.mrf.mxu2 }
 0x11d   : > { %v651_v31 = vmul.f32 %v2987_v17, %v615_v30 }
 0x11e   : > { %v836_v32 = vld [vmem:[#allocation2 + $0x6c] sm:$0x1]  ;;  %v865_v33 = vld [vmem:[#allocation2 + $0x68] sm:$0x1] }
 0x11f   : > { %v837_v34 = vsel %vm3007_vm4, 0, %v836_v32  ;;  %v866_v35 = vsel %vm3016_vm6, 0, %v865_v33  ;;  %v685_v37 = vadd.f32 %v2993_v20, %v651_v31 }
 0x120   : > { %838 = vst [vmem:[#allocation2 + $0x6c] sm:$0x1] %v837_v34 }
 0x121   : > { %867 = vst [vmem:[#allocation2 + $0x68] sm:$0x1] %v866_v35  ;;  %v715_v38 = vmax.f32 %v685_v37, 0.0 }
 0x123   : > { %v745_v40 = vmin.f32 %v715_v38, 6.0 }
 0x125   : > { %v2558_v41 = vpack.c.bf16 %v745_v40, %v744_v39 }
 0x127   : > { %2621 = vst [vmem:[#allocation2 + $0x70] sm:$0xff] %v2558_v41  }
 0x12c   : > { %874 = sbr.rel (%p2423_p13) target bundleno = 309 (0x135), region = 64 }
 0x12e   : > { %v868_v17 = vld [vmem:[#allocation2 + $0x74] sm:$0x1] }
 0x12f   : > { %v869_v42 = vsel %vm3016_vm6, 0, %v868_v17 }
 0x130   : > { %870 = vst [vmem:[#allocation2 + $0x74] sm:$0x1] %v869_v42 }
 0x131   : > { %v2824_v49 = vmov 0  }
 0x132   : > { %875 = vst [vmem:[#allocation2] sm:$0xf] %v2824_v49 }
 0x133   : > { %876 = vst [vmem:[#allocation2 + $0x4] sm:$0xf] %v2824_v49 }
 0x134   : > { %877 = vst [vmem:[#allocation2 + $0x8] sm:$0xf] %v2824_v49 }
 0x135 PF: > { %p2424_p0 = scmp.ne.s32.totalorder %s2806_s16, 1 }
 0x137   : > { %881 = sbr.rel (%p2424_p0) target bundleno = 320 (0x140), region = 68 }
 0x13c   : > { %v2825_v20 = vmov 0  }
 0x13d   : > { %883 = vst [vmem:[#allocation2 + $0x6c] sm:$0xf] %v2825_v20 }
 0x13e   : > { %884 = vst [vmem:[#allocation2 + $0x70] sm:$0xf] %v2825_v20 }
 0x13f   : > { %885 = vst [vmem:[#allocation2 + $0x74] sm:$0xf] %v2825_v20 }
 0x140 PF: > { %v2484_v56 = vld [vmem:[%s3694_s7 + $0x38] sm:$0xff]  ;;  %v2483_v43 = vld [vmem:[%s3694_s7 + $0x30] sm:$0xff]  ;;  %v3118_v44 = vld [vmem:[%s3691_s4] sm:$0xff]  ;;  %vm1018_vm7 = vcmask 1046528   ;;  %vm1156_vm8 = vcmask 1045504   ;;  %s2458_s22 = sshll.u32 %s2810_s17, 5 }
 0x141   : > { %2109 = vmatpush.bf16.msra.mxu1 %v2484_v56  ;;  %2633 = vmatpush.bf16.msra.mxu3 %v2484_v56  ;;  %v2561_v45 = vld [vmem:[#allocation2] sm:$0xff]   ;;  %v3121_v46 = vperm.slane %v3118_v44, 0  ;;  %v953_v47 = vld [vmem:[#allocation2 + $0x8] sm:$0x1]  ;;  %v3124_v52 = vperm.slane %v3118_v44, 1  ;;  %v1230_v54 = vld [vmem:[#allocation2 + $0xc] sm:$0xff]   ;;  %s2257_s25 = sadd.s32 %s2806_s16, %s2458_s22 }
 0x142   : > { %v2562_v48 = vunpack.c.l.bf16 %v2561_v45  ;;  %v2563_v50 = vunpack.c.h.bf16 %v2561_v45  ;;  %v961_v51 = vunpack.c.l.bf16 %v953_v47  ;;  %v1091_v53 = vld [vmem:[#allocation2] sm:$0xe]  ;;  %v3127_v57 = vperm.slane %v3118_v44, 2  ;;  %v1295_v60 = vld [vmem:[#allocation2 + $0x14] sm:$0x1]  ;;  %v2482_v61 = vld [vmem:[%s3694_s7 + $0x28] sm:$0xff] }
 0x143   : > { %v1099_v55 = vunpack.c.l.bf16 %v1091_v53  ;;  %v1246_v58 = vunpack.c.l.bf16 %v1230_v54  ;;  %v1247_v59 = vunpack.c.h.bf16 %v1230_v54  ;;  %v3141_v8 = vperm.slane %v3118_v44, 3  ;;  %v2481_v14 = vld [vmem:[%s3694_s7 + $0x20] sm:$0xff]  ;;  %v1432_v21 = vld [vmem:[#allocation2 + $0xc] sm:$0xe]  ;;  %v2593_v22 = vld [vmem:[#allocation2 + $0x18] sm:$0xff]   ;;  %s2459_s28 = sshll.u32 %s2257_s25, 3 }
 0x144   : > { %v921_v62 = vmul.f32 %v2562_v48, %v3121_v46  ;;  %v922_v63 = vmul.f32 %v2563_v50, %v3121_v46  ;;  %v970_v0 = vmul.f32 %v2562_v48, %v3124_v52  ;;  %v971_v1 = vmul.f32 %v2563_v50, %v3124_v52  ;;  %v2480_v35 = vld [vmem:[%s3694_s7 + $0x18] sm:$0xff]  ;;  %v1635_v49 = vld [vmem:[#allocation2 + $0x20] sm:$0x1]  ;;  %v3172_v20 = vld [vmem:[%s3691_s4 + $0x8] ss:$0 sm:$0xff]  ;;  %s2259_s12 = scalar_lea.hbm %s3697_s10, %s2459_s28  ;;  %s2260_s21 = sshll.u32 %s3105_s18, 4  ;;  %s2261_s21 = int_to_ptr.vmem [resolvable:$true] %s2260_s21 }
 0x145   : > { %2110 = vmatpush.bf16.msra.mxu1 %v2483_v43  ;;  %v972_v2 = vmul.f32 %v3124_v52, %v961_v51  ;;  %v1108_v3 = vmul.f32 %v3127_v57, %v1099_v55  ;;  %v1109_v4 = vmul.f32 %v2563_v50, %v3127_v57  ;;  %v1110_v5 = vmul.f32 %v3127_v57, %v961_v51  ;;  %v1772_v48 = vld [vmem:[#allocation2 + $0x18] sm:$0xe]  ;;  %v2479_v55 = vld [vmem:[%s3694_s7 + $0x10] sm:$0xff]  ;;  %s2262_s19 = sshll.u32 %s2259_s12, 4  ;;  %s2247_s23 = scalar_lea.sflag [#allocation4], %s364_s24  ;;  %s2263_s19 = int_to_ptr.hbm [resolvable:$true] %s2262_s19 }
 0x146   : > { %2634 = vmatpush.bf16.msra.mxu3 %v2483_v43  ;;  %v1019_v6 = vrot.slane %v970_v0, 1  ;;  %v1020_v7 = vrot.slane %v971_v1, 1  ;;  %v1303_v9 = vunpack.c.l.bf16 %v1295_v60  ;;  %v1263_v16 = vmul.f32 %v3141_v8, %v1246_v58  ;;  %s2742_s0 = sshra.s32 %s2263_s19, 4  ;;  %s2748_s25 = scalar_lea.hbm %s3697_s10, 512  ;;  %s2743_s0 = int_to_ptr.hbm [resolvable:$true] %s2742_s0 }
 0x147   : > { %v1022_v10 = vrot.slane %v972_v2, 1  ;;  %v1157_v11 = vrot.slane %v1108_v3, 2  ;;  %v1158_v12 = vrot.slane %v1109_v4, 2  ;;  %v1160_v13 = vrot.slane %v1110_v5, 2  ;;  %s2744_s17 = scalar_lea.hbm %s2743_s0, 128  ;;  %p2749_p5 = scmp.lt.s32.totalorder %s2743_s0, %s3697_s10 }
 0x148   : > { %v1021_v15 = vsel %vm1018_vm7, %v1019_v6, %v1020_v7  ;;  %v1264_v18 = vmul.f32 %v3141_v8, %v1247_v59  ;;  %v3150_v19 = vperm.slane %v3118_v44, 4  ;;  %v1440_v32 = vunpack.c.l.bf16 %v1432_v21  ;;  %p2745_p1 = scmp.ne.s32.totalorder %s2743_s0, %s2744_s17  ;;  %p2750_p6 = scmp.lt.s32.totalorder %s2748_s25, %s2744_s17 }
 0x149   : > { %2111 = vmatpush.bf16.msra.mxu1 %v2482_v61  ;;  %v1023_v23 = vsel %vm1018_vm7, %v1020_v7, %v1022_v10  ;;  %v1075_v24 = vadd.f32 %v1021_v15, %v921_v62  ;;  %v1159_v25 = vsel %vm1156_vm8, %v1157_v11, %v1158_v12  ;;  %v1161_v26 = vsel %vm1156_vm8, %v1158_v12, %v1160_v13  ;;  %v890_v10 = vld [vmem:[#allocation2 + $0xc] sm:$0xff]   ;;  %v954_v11 = vld [vmem:[#allocation2 + $0x14] sm:$0x1] }
 0x14a   : > { %2635 = vmatpush.bf16.msra.mxu3 %v2482_v61  ;;  %v1076_v27 = vadd.f32 %v1023_v23, %v922_v63  ;;  %v1312_v28 = vmul.f32 %v3150_v19, %v1246_v58  ;;  %v1313_v29 = vmul.f32 %v3150_v19, %v1247_v59  ;;  %v1314_v30 = vmul.f32 %v3150_v19, %v1303_v9  ;;  %v2478_v12 = vld [vmem:[%s3694_s7 + $0x8] sm:$0xff]  ;;  %p2746_p2 = pnand %p2745_p1, %p2935_p3  ;;  %p2751_p7 = por %p2750_p6, %p2749_p5 }
 0x14b   : > { %v1213_v31 = vadd.f32 %v1159_v25, %v1075_v24  ;;  %v3159_v33 = vperm.slane %v3118_v44, 5  ;;  %v3161_v34 = vunpack.c.l.bf16 %v2593_v22  ;;  %v3176_v47 = vunpack.c.h.bf16 %v2593_v22 }
 0x14c   : > { %v1214_v36 = vadd.f32 %v1161_v26, %v1076_v27  ;;  %v1360_v37 = vrot.slane %v1312_v28, 1  ;;  %v1361_v38 = vrot.slane %v1313_v29, 1  ;;  %v1363_v39 = vrot.slane %v1314_v30, 1  ;;  %p2747_p4 = pneg %p2746_p2 }
 0x14d   : > { %2112 = vmatpush.bf16.msra.mxu1 %v2481_v14  ;;  %v1279_v40 = vadd.f32 %v1263_v16, %v1213_v31  ;;  %v1449_v41 = vmul.f32 %v3159_v33, %v1440_v32  ;;  %v1450_v17 = vmul.f32 %v3159_v33, %v1247_v59  ;;  %v1451_v42 = vmul.f32 %v3159_v33, %v1303_v9 }
 0x14e   : > { %2636 = vmatpush.bf16.msra.mxu3 %v2481_v14  ;;  %v1280_v56 = vadd.f32 %v1264_v18, %v1214_v36  ;;  %v1362_v43 = vsel %vm1018_vm7, %v1360_v37, %v1361_v38  ;;  %v1364_v45 = vsel %vm1018_vm7, %v1361_v38, %v1363_v39  ;;  %v3182_v59 = vperm.slane %v3118_v44, 6  ;;  %v1092_v18 = vld [vmem:[#allocation2 + $0xc] sm:$0xe]  ;;  %v3215_v39 = vld [vmem:[%s3692_s5] ss:$0 sm:$0xff]  ;;  %p2752_p9 = pnand %p2751_p7, %p2747_p4 }
 0x14f   : > { %v1416_v50 = vadd.f32 %v1362_v43, %v1279_v40  ;;  %v1497_v51 = vrot.slane %v1449_v41, 2  ;;  %v1498_v53 = vrot.slane %v1450_v17, 2  ;;  %v1500_v54 = vrot.slane %v1451_v42, 2 }
 0x150   : > { %v1417_v58 = vadd.f32 %v1364_v45, %v1280_v56  ;;  %v1643_v60 = vunpack.c.l.bf16 %v1635_v49  ;;  %v3185_v61 = vperm.slane %v3118_v44, 7  ;;  %v1780_v0 = vunpack.c.l.bf16 %v1772_v48  ;;  %v3225_v45 = vld [vmem:[%s3693_s6] ss:$0 sm:$0xff] }
 0x151   : > { %2113 = vmatpush.bf16.msra.mxu1 %v2480_v35  ;;  %v1499_v62 = vsel %vm1156_vm8, %v1497_v51, %v1498_v53  ;;  %v1501_v63 = vsel %vm1156_vm8, %v1498_v53, %v1500_v54  ;;  %v1790_v1 = vmul.f32 %v3172_v20, %v3176_v47  ;;  %v1603_v4 = vmul.f32 %v3161_v34, %v3182_v59 }
 0x152   : > { %2637 = vmatpush.bf16.msra.mxu3 %v2480_v35  ;;  %v1553_v2 = vadd.f32 %v1499_v62, %v1416_v50  ;;  %v1554_v3 = vadd.f32 %v1501_v63, %v1417_v58  ;;  %v1604_v5 = vmul.f32 %v3176_v47, %v3182_v59  ;;  %v1652_v44 = vmul.f32 %v3161_v34, %v3185_v61  ;;  %v2477_v35 = vld [vmem:[%s3694_s7] sm:$0xff] }
 0x153   : > { %v1653_v6 = vmul.f32 %v3176_v47, %v3185_v61  ;;  %v1654_v7 = vmul.f32 %v3185_v61, %v1643_v60  ;;  %v1789_v9 = vmul.f32 %v3172_v20, %v1780_v0  ;;  %v1791_v15 = vmul.f32 %v3172_v20, %v1643_v60  ;;  %v1296_v0 = vld [vmem:[#allocation2 + $0x20] sm:$0x1] }
 0x154   : > { %v1619_v13 = vadd.f32 %v1603_v4, %v1553_v2  ;;  %v1620_v14 = vadd.f32 %v1604_v5, %v1554_v3  ;;  %v1838_v16 = vrot.slane %v1790_v1, 2  ;;  %v1700_v21 = vrot.slane %v1652_v44, 1 }
 0x155   : > { %2114 = vmatpush.bf16.msra.mxu1 %v2479_v55  ;;  %v1701_v22 = vrot.slane %v1653_v6, 1  ;;  %v1703_v23 = vrot.slane %v1654_v7, 1  ;;  %v1837_v24 = vrot.slane %v1789_v9, 2  ;;  %v1840_v25 = vrot.slane %v1791_v15, 2  ;;  %v1433_v9 = vld [vmem:[#allocation2 + $0x18] sm:$0xe] }
 0x156   : > { %2638 = vmatpush.bf16.msra.mxu3 %v2479_v55  ;;  %v906_v26 = vunpack.c.l.bf16 %v890_v10  ;;  %v907_v27 = vunpack.c.h.bf16 %v890_v10  ;;  %v962_v28 = vunpack.c.l.bf16 %v954_v11  ;;  %v1100_v32 = vunpack.c.l.bf16 %v1092_v18 }
 0x157   : > { %v1702_v29 = vsel %vm1018_vm7, %v1700_v21, %v1701_v22  ;;  %v1704_v30 = vsel %vm1018_vm7, %v1701_v22, %v1703_v23  ;;  %v1839_v31 = vsel %vm1156_vm8, %v1837_v24, %v1838_v16  ;;  %v1841_v38 = vsel %vm1156_vm8, %v1838_v16, %v1840_v25 }
 0x158   : > { %v1756_v36 = vadd.f32 %v1702_v29, %v1619_v13  ;;  %v1757_v37 = vadd.f32 %v1704_v30, %v1620_v14  ;;  %v923_v40 = vmul.f32 %v3121_v46, %v906_v26  ;;  %v924_v41 = vmul.f32 %v3121_v46, %v907_v27  ;;  %v1572_v29 = vld [vmem:[#allocation2 + $0x24] sm:$0xff]  }
 0x159   : > { %2115 = vmatpush.bf16.msra.mxu1 %v2478_v12  ;;  %v973_v17 = vmul.f32 %v3124_v52, %v906_v26  ;;  %v974_v42 = vmul.f32 %v3124_v52, %v907_v27  ;;  %v975_v49 = vmul.f32 %v3124_v52, %v962_v28  ;;  %v1111_v48 = vmul.f32 %v3127_v57, %v1100_v32 }
 0x15a   : > { %2639 = vmatpush.bf16.msra.mxu3 %v2478_v12  ;;  %v1893_v56 = vadd.f32 %v1839_v31, %v1756_v36  ;;  %v1894_v43 = vadd.f32 %v1841_v38, %v1757_v37  ;;  %v1112_v50 = vmul.f32 %v3127_v57, %v907_v27  ;;  %v1113_v55 = vmul.f32 %v3127_v57, %v962_v28 }
 0x15b   : > { %v1024_v51 = vrot.slane %v973_v17, 1  ;;  %v1025_v53 = vrot.slane %v974_v42, 1  ;;  %v1027_v54 = vrot.slane %v975_v49, 1  ;;  %v1162_v62 = vrot.slane %v1111_v48, 2 }
 0x15c   : > { %v1913_v58 = vmul.f32 %v3215_v39, %v1893_v56  ;;  %v1914_v60 = vmul.f32 %v3215_v39, %v1894_v43  ;;  %v1163_v63 = vrot.slane %v1112_v50, 2  ;;  %v1165_v3 = vrot.slane %v1113_v55, 2  ;;  %v1636_v56 = vld [vmem:[#allocation2 + $0x2c] sm:$0x1]  ;;  %v1773_v43 = vld [vmem:[#allocation2 + $0x24] sm:$0xe] }
 0x15d   : > { %2116 = vmatpush.bf16.msra.mxu1 %v2477_v35  ;;  %v1026_v1 = vsel %vm1018_vm7, %v1024_v51, %v1025_v53  ;;  %v1028_v2 = vsel %vm1018_vm7, %v1025_v53, %v1027_v54  ;;  %v1265_v4 = vmul.f32 %v3161_v34, %v3141_v8  ;;  %v1266_v12 = vmul.f32 %v3176_v47, %v3141_v8 }
 0x15e   : > { %2640 = vmatpush.bf16.msra.mxu3 %v2477_v35  ;;  %v1933_v5 = vadd.f32 %v3225_v45, %v1913_v58  ;;  %v1934_v44 = vadd.f32 %v3225_v45, %v1914_v60  ;;  %v1077_v6 = vadd.f32 %v1026_v1, %v923_v40  ;;  %v1078_v7 = vadd.f32 %v1028_v2, %v924_v41 }
 0x15f   : > { %v1164_v10 = vsel %vm1156_vm8, %v1162_v62, %v1163_v63  ;;  %v1166_v11 = vsel %vm1156_vm8, %v1163_v63, %v1165_v3  ;;  %v1304_v13 = vunpack.c.l.bf16 %v1296_v0  ;;  %v1315_v21 = vmul.f32 %v3161_v34, %v3150_v19 }
 0x160   : > { %v1949_v14 = vmax.f32 %v1933_v5, 0.0  ;;  %v1950_v15 = vmax.f32 %v1934_v44, 0.0  ;;  %v1215_v16 = vadd.f32 %v1164_v10, %v1077_v6  ;;  %v1216_v18 = vadd.f32 %v1166_v11, %v1078_v7 }
 0x161   : > { %v1316_v22 = vmul.f32 %v3176_v47, %v3150_v19  ;;  %v1317_v23 = vmul.f32 %v3150_v19, %v1304_v13  ;;  %v1441_v24 = vunpack.c.l.bf16 %v1433_v9  ;;  %v1365_v30 = vrot.slane %v1315_v21, 1 }
 0x162   : > { %v1965_v25 = vmin.f32 %v1949_v14, 6.0  ;;  %v1966_v26 = vmin.f32 %v1950_v15, 6.0  ;;  %v1281_v27 = vadd.f32 %v1265_v4, %v1215_v16  ;;  %v1282_v28 = vadd.f32 %v1266_v12, %v1216_v18  ;;  %v955_v14 = vld [vmem:[#allocation2 + $0x20] sm:$0x1] }
 0x163   : > { %v1366_v31 = vrot.slane %v1316_v22, 1  ;;  %v1368_v32 = vrot.slane %v1317_v23, 1  ;;  %v1452_v35 = vmul.f32 %v3159_v33, %v1441_v24  ;;  %v1453_v38 = vmul.f32 %v3176_v47, %v3159_v33 }
 0x164   : > { %v1981_v36 = vpack.c.bf16 %v1965_v25, %v1965_v25  ;;  %v1982_v37 = vpack.c.bf16 %v1966_v26, %v1966_v26  ;;  %v1454_v40 = vmul.f32 %v3159_v33, %v1304_v13  ;;  %v1588_v49 = vunpack.c.l.bf16 %v1572_v29  ;;  %v1093_v26 = vld [vmem:[#allocation2 + $0x18] sm:$0xe] }
 0x165   : > { %v1367_v41 = vsel %vm1018_vm7, %v1365_v30, %v1366_v31  ;;  %v1369_v17 = vsel %vm1018_vm7, %v1366_v31, %v1368_v32  ;;  %v1502_v42 = vrot.slane %v1452_v35, 2  ;;  %v1503_v54 = vrot.slane %v1453_v38, 2 }
 0x166   : > { %v2029_v48 = vunpack.c.l.b16 %v1981_v36  ;;  %v2030_v50 = vunpack.c.l.b16 %v1982_v37  ;;  %v1418_v51 = vadd.f32 %v1367_v41, %v1281_v27  ;;  %v1419_v53 = vadd.f32 %v1369_v17, %v1282_v28  ;;  %v1234_v17 = vld [vmem:[#allocation2 + $0x24] sm:$0xff]  }
 0x167   : > { %v1505_v55 = vrot.slane %v1454_v40, 2  ;;  %v1589_v58 = vunpack.c.h.bf16 %v1572_v29  ;;  %v1605_v60 = vmul.f32 %v3182_v59, %v1588_v49  ;;  %v1644_v63 = vunpack.c.l.bf16 %v1636_v56 }
 0x168   : > { %v2045_v62 = vpack.c.b16 %v2030_v50, %v2029_v48  ;;  %v1655_v0 = vmul.f32 %v3185_v61, %v1588_v49  ;;  %v1781_v1 = vunpack.c.l.bf16 %v1773_v43  ;;  %v1504_v2 = vsel %vm1156_vm8, %v1502_v42, %v1503_v54 }
 0x169   : > { %v1506_v3 = vsel %vm1156_vm8, %v1503_v54, %v1505_v55  ;;  %v1606_v4 = vmul.f32 %v3182_v59, %v1589_v58  ;;  %v1656_v5 = vmul.f32 %v3185_v61, %v1589_v58  ;;  %v1555_v44 = vadd.f32 %v1504_v2, %v1418_v51 }
 0x16a   : > { %2117 = vmatmul.bf16.vlgmr.msra.gmra.mxu1 %v2045_v62  ;;  %v1556_v6 = vadd.f32 %v1506_v3, %v1419_v53  ;;  %v1657_v7 = vmul.f32 %v3185_v61, %v1644_v63  ;;  %v1705_v9 = vrot.slane %v1655_v0, 1  ;;  %v1792_v11 = vmul.f32 %v3172_v20, %v1781_v1  ;;  %v1297_v0 = vld [vmem:[#allocation2 + $0x2c] sm:$0x1] }
 0x16b   : > { %v1706_v10 = vrot.slane %v1656_v5, 1  ;;  %v1793_v12 = vmul.f32 %v3172_v20, %v1589_v58  ;;  %v1794_v13 = vmul.f32 %v3172_v20, %v1644_v63  ;;  %v1621_v15 = vadd.f32 %v1605_v60, %v1555_v44 }
 0x16c   : > { %v1622_v16 = vadd.f32 %v1606_v4, %v1556_v6  ;;  %v1708_v18 = vrot.slane %v1657_v7, 1  ;;  %v925_v21 = vmul.f32 %v3161_v34, %v3121_v46  ;;  %v1842_v23 = vrot.slane %v1792_v11, 2 }
 0x16d   : > { %v1707_v22 = vsel %vm1018_vm7, %v1705_v9, %v1706_v10  ;;  %v1843_v24 = vrot.slane %v1793_v12, 2  ;;  %v1845_v25 = vrot.slane %v1794_v13, 2  ;;  %v926_v29 = vmul.f32 %v3176_v47, %v3121_v46  ;;  %v1434_v9 = vld [vmem:[#allocation2 + $0x24] sm:$0xe] }
 0x16e   : > { %v1709_v27 = vsel %vm1018_vm7, %v1706_v10, %v1708_v18  ;;  %v1758_v28 = vadd.f32 %v1707_v22, %v1621_v15  ;;  %v963_v30 = vunpack.c.l.bf16 %v955_v14  ;;  %v976_v36 = vmul.f32 %v3161_v34, %v3124_v52 }
 0x16f   : > { %v1759_v31 = vadd.f32 %v1709_v27, %v1622_v16  ;;  %v1844_v32 = vsel %vm1156_vm8, %v1842_v23, %v1843_v24  ;;  %v1846_v35 = vsel %vm1156_vm8, %v1843_v24, %v1845_v25  ;;  %v977_v38 = vmul.f32 %v3176_v47, %v3124_v52  ;;  %v2629_v25 = vld [vmem:[#allocation2 + $0x30] sm:$0xff]  }
 0x170   : > { %v1895_v37 = vadd.f32 %v1844_v32, %v1758_v28  ;;  %v978_v40 = vmul.f32 %v3124_v52, %v963_v30  ;;  %v1101_v41 = vunpack.c.l.bf16 %v1093_v26  ;;  %v1029_v49 = vrot.slane %v976_v36, 1 }
 0x171   : > { %v1896_v42 = vadd.f32 %v1846_v35, %v1759_v31  ;;  %v1115_v56 = vmul.f32 %v3176_v47, %v3127_v57  ;;  %v1116_v43 = vmul.f32 %v3127_v57, %v963_v30  ;;  %v1030_v50 = vrot.slane %v977_v38, 1 }
 0x172   : > { %v1915_v48 = vmul.f32 %v3215_v39, %v1895_v37  ;;  %v1032_v51 = vrot.slane %v978_v40, 1  ;;  %v1114_v34 = vmul.f32 %v3127_v57, %v1101_v41  ;;  %v1250_v58 = vunpack.c.l.bf16 %v1234_v17  ;;  %v1637_v41 = vld [vmem:[#allocation2 + $0x38] sm:$0x1] }
 0x173   : > { %v1916_v53 = vmul.f32 %v3215_v39, %v1896_v42  ;;  %v1168_v54 = vrot.slane %v1115_v56, 2  ;;  %v1170_v55 = vrot.slane %v1116_v43, 2  ;;  %v1031_v62 = vsel %vm1018_vm7, %v1029_v49, %v1030_v50 }
 0x174   : > { %v1935_v60 = vadd.f32 %v3225_v45, %v1915_v48  ;;  %v1033_v63 = vsel %vm1018_vm7, %v1030_v50, %v1032_v51  ;;  %v1167_v47 = vrot.slane %v1114_v34, 2  ;;  %v1079_v2 = vadd.f32 %v1031_v62, %v925_v21 }
 0x175   : > { %v1936_v1 = vadd.f32 %v3225_v45, %v1916_v53  ;;  %v1080_v3 = vadd.f32 %v1033_v63, %v926_v29  ;;  %v1171_v4 = vsel %vm1156_vm8, %v1168_v54, %v1170_v55  ;;  %v1251_v6 = vunpack.c.h.bf16 %v1234_v17 }
 0x176   : > { %v1951_v5 = vmax.f32 %v1935_v60, 0.0  ;;  %v1169_v44 = vsel %vm1156_vm8, %v1167_v47, %v1168_v54  ;;  %v1267_v7 = vmul.f32 %v3141_v8, %v1250_v58  ;;  %v1305_v13 = vunpack.c.l.bf16 %v1297_v0  ;;  %v894_v0 = vld [vmem:[#allocation2 + $0x24] sm:$0xff]  }
 0x177   : > { %v1952_v10 = vmax.f32 %v1936_v1, 0.0  ;;  %v1217_v11 = vadd.f32 %v1169_v44, %v1079_v2  ;;  %v1218_v12 = vadd.f32 %v1171_v4, %v1080_v3  ;;  %v1268_v15 = vmul.f32 %v3141_v8, %v1251_v6 }
 0x178   : > { %v1967_v14 = vmin.f32 %v1951_v5, 6.0  ;;  %v1318_v16 = vmul.f32 %v3150_v19, %v1250_v58  ;;  %v1319_v18 = vmul.f32 %v3150_v19, %v1251_v6  ;;  %v1320_v23 = vmul.f32 %v3150_v19, %v1305_v13  ;;  %v1774_v58 = vld [vmem:[#allocation2 + $0x30] sm:$0xe] }
 0x179   : > { %v1968_v21 = vmin.f32 %v1952_v10, 6.0  ;;  %v1283_v22 = vadd.f32 %v1267_v7, %v1217_v11  ;;  %v1442_v24 = vunpack.c.l.bf16 %v1434_v9  ;;  %v1284_v27 = vadd.f32 %v1268_v15, %v1218_v12 }
 0x17a   : > { %v1983_v26 = vpack.c.bf16 %v1967_v14, %v1967_v14  ;;  %v1370_v28 = vrot.slane %v1318_v16, 1  ;;  %v1371_v29 = vrot.slane %v1319_v18, 1  ;;  %v1373_v31 = vrot.slane %v1320_v23, 1 }
 0x17b   : > { %v1984_v30 = vpack.c.bf16 %v1968_v21, %v1968_v21  ;;  %v1455_v32 = vmul.f32 %v3159_v33, %v1442_v24  ;;  %v1456_v35 = vmul.f32 %v3159_v33, %v1251_v6  ;;  %v1457_v38 = vmul.f32 %v3159_v33, %v1305_v13  ;;  %v956_v13 = vld [vmem:[#allocation2 + $0x2c] sm:$0x1]  ;;  %v1094_v21 = vld [vmem:[#allocation2 + $0x24] sm:$0xe] }
 0x17c   : > { %v2031_v36 = vunpack.c.l.b16 %v1983_v26  ;;  %v1372_v37 = vsel %vm1018_vm7, %v1370_v28, %v1371_v29  ;;  %v3297_v40 = vunpack.c.l.bf16 %v2629_v25  ;;  %v1374_v42 = vsel %vm1018_vm7, %v1371_v29, %v1373_v31 }
 0x17d   : > { %v2032_v17 = vunpack.c.l.b16 %v1984_v30  ;;  %v1420_v49 = vadd.f32 %v1372_v37, %v1283_v22  ;;  %v1507_v56 = vrot.slane %v1455_v32, 2  ;;  %v1421_v43 = vadd.f32 %v1374_v42, %v1284_v27 }
 0x17e   : > { %v1508_v48 = vrot.slane %v1456_v35, 2  ;;  %v1510_v50 = vrot.slane %v1457_v38, 2  ;;  %v3300_v51 = vunpack.c.h.bf16 %v2629_v25  ;;  %v1607_v53 = vmul.f32 %v3297_v40, %v3182_v59 }
 0x17f   : > { %v2046_v34 = vpack.c.b16 %v2032_v17, %v2031_v36  ;;  %v1645_v54 = vunpack.c.l.bf16 %v1637_v41  ;;  %v1658_v55 = vmul.f32 %v3297_v40, %v3185_v61  ;;  %v1782_v44 = vunpack.c.l.bf16 %v1774_v58 }
 0x180   : > { %v1509_v60 = vsel %vm1156_vm8, %v1507_v56, %v1508_v48  ;;  %v1511_v62 = vsel %vm1156_vm8, %v1508_v48, %v1510_v50  ;;  %v1608_v63 = vmul.f32 %v3300_v51, %v3182_v59  ;;  %v1659_v47 = vmul.f32 %v3300_v51, %v3185_v61 }
 0x181   : > { %2122 = vmatmul.bf16.gmra.mxu1 %v2046_v34  ;;  %v1557_v1 = vadd.f32 %v1509_v60, %v1420_v49  ;;  %v1558_v2 = vadd.f32 %v1511_v62, %v1421_v43  ;;  %v1660_v3 = vmul.f32 %v3185_v61, %v1645_v54  ;;  %v1710_v4 = vrot.slane %v1658_v55, 1  ;;  %v1298_v60 = vld [vmem:[#allocation2 + $0x38] sm:$0x1] }
 0x182   : > { %v1711_v5 = vrot.slane %v1659_v47, 1  ;;  %v1796_v6 = vmul.f32 %v3172_v20, %v3300_v51  ;;  %v1797_v7 = vmul.f32 %v3172_v20, %v1645_v54  ;;  %v910_v12 = vunpack.c.l.bf16 %v894_v0 }
 0x183   : > { %v1623_v9 = vadd.f32 %v1607_v53, %v1557_v1  ;;  %v1624_v10 = vadd.f32 %v1608_v63, %v1558_v2  ;;  %v1713_v11 = vrot.slane %v1660_v3, 1  ;;  %v1795_v15 = vmul.f32 %v3172_v20, %v1782_v44 }
 0x184   : > { %v1712_v14 = vsel %vm1018_vm7, %v1710_v4, %v1711_v5  ;;  %v1848_v16 = vrot.slane %v1796_v6, 2  ;;  %v1850_v18 = vrot.slane %v1797_v7, 2  ;;  %v911_v24 = vunpack.c.h.bf16 %v894_v0 }
 0x185   : > { %v1714_v22 = vsel %vm1018_vm7, %v1711_v5, %v1713_v11  ;;  %v1760_v23 = vadd.f32 %v1712_v14, %v1623_v9  ;;  %v927_v25 = vmul.f32 %v3121_v46, %v910_v12  ;;  %v1847_v27 = vrot.slane %v1795_v15, 2  ;;  %v1435_v5 = vld [vmem:[#allocation2 + $0x30] sm:$0xe] }
 0x186   : > { %v1761_v26 = vadd.f32 %v1714_v22, %v1624_v10  ;;  %v1851_v28 = vsel %vm1156_vm8, %v1848_v16, %v1850_v18  ;;  %v964_v29 = vunpack.c.l.bf16 %v956_v13  ;;  %v928_v30 = vmul.f32 %v3121_v46, %v911_v24 }
 0x187   : > { %v979_v31 = vmul.f32 %v3124_v52, %v910_v12  ;;  %v980_v32 = vmul.f32 %v3124_v52, %v911_v24  ;;  %v1102_v35 = vunpack.c.l.bf16 %v1094_v21  ;;  %v1849_v36 = vsel %vm1156_vm8, %v1847_v27, %v1848_v16  ;;  %v1576_v21 = vld [vmem:[#allocation2 + $0x3c] sm:$0xff]  }
 0x188   : > { %v1898_v37 = vadd.f32 %v1851_v28, %v1761_v26  ;;  %v981_v38 = vmul.f32 %v3124_v52, %v964_v29  ;;  %v1118_v41 = vmul.f32 %v3127_v57, %v911_v24  ;;  %v1897_v17 = vadd.f32 %v1849_v36, %v1760_v23  ;;  %v1638_v36 = vld [vmem:[#allocation2 + $0x44] sm:$0x1] }
 0x189   : > { %v1034_v42 = vrot.slane %v979_v31, 1  ;;  %v1035_v49 = vrot.slane %v980_v32, 1  ;;  %v1117_v56 = vmul.f32 %v3127_v57, %v1102_v35  ;;  %v1119_v50 = vmul.f32 %v3127_v57, %v964_v29 }
 0x18a   : > { %v1918_v43 = vmul.f32 %v3215_v39, %v1898_v37  ;;  %v1037_v48 = vrot.slane %v981_v38, 1  ;;  %v1173_v34 = vrot.slane %v1118_v41, 2  ;;  %v1917_v53 = vmul.f32 %v3215_v39, %v1897_v17 }
 0x18b   : > { %v1036_v54 = vsel %vm1018_vm7, %v1034_v42, %v1035_v49  ;;  %v1172_v55 = vrot.slane %v1117_v56, 2  ;;  %v1269_v58 = vmul.f32 %v3297_v40, %v3141_v8  ;;  %v1175_v0 = vrot.slane %v1119_v50, 2  ;;  %v1775_v42 = vld [vmem:[#allocation2 + $0x3c] sm:$0xe] }
 0x18c   : > { %v1938_v62 = vadd.f32 %v3225_v45, %v1918_v43  ;;  %v1038_v63 = vsel %vm1018_vm7, %v1035_v49, %v1037_v48  ;;  %v1081_v47 = vadd.f32 %v1036_v54, %v927_v25  ;;  %v1937_v1 = vadd.f32 %v3225_v45, %v1917_v53 }
 0x18d   : > { %v1082_v2 = vadd.f32 %v1038_v63, %v928_v30  ;;  %v1174_v3 = vsel %vm1156_vm8, %v1172_v55, %v1173_v34  ;;  %v1270_v4 = vmul.f32 %v3300_v51, %v3141_v8  ;;  %v1176_v6 = vsel %vm1156_vm8, %v1173_v34, %v1175_v0 }
 0x18e   : > { %v1954_v44 = vmax.f32 %v1938_v62, 0.0  ;;  %v1219_v7 = vadd.f32 %v1174_v3, %v1081_v47  ;;  %v1306_v9 = vunpack.c.l.bf16 %v1298_v60  ;;  %v1953_v10 = vmax.f32 %v1937_v1, 0.0 }
 0x18f   : > { %v1220_v11 = vadd.f32 %v1176_v6, %v1082_v2  ;;  %v1321_v12 = vmul.f32 %v3297_v40, %v3150_v19  ;;  %v1322_v13 = vmul.f32 %v3300_v51, %v3150_v19  ;;  %v1443_v18 = vunpack.c.l.bf16 %v1435_v5 }
 0x190   : > { %v1970_v14 = vmin.f32 %v1954_v44, 6.0  ;;  %v1285_v15 = vadd.f32 %v1269_v58, %v1219_v7  ;;  %v1323_v16 = vmul.f32 %v3150_v19, %v1306_v9  ;;  %v1969_v22 = vmin.f32 %v1953_v10, 6.0  ;;  %v957_v44 = vld [vmem:[#allocation2 + $0x38] sm:$0x1] }
 0x191   : > { %v1286_v23 = vadd.f32 %v1270_v4, %v1220_v11  ;;  %v1375_v24 = vrot.slane %v1321_v12, 1  ;;  %v1376_v25 = vrot.slane %v1322_v13, 1  ;;  %v1458_v28 = vmul.f32 %v3159_v33, %v1443_v18 }
 0x192   : > { %v1986_v26 = vpack.c.bf16 %v1970_v14, %v1970_v14  ;;  %v1378_v27 = vrot.slane %v1323_v16, 1  ;;  %v1459_v29 = vmul.f32 %v3300_v51, %v3159_v33  ;;  %v1985_v30 = vpack.c.bf16 %v1969_v22, %v1969_v22  ;;  %v1095_v22 = vld [vmem:[#allocation2 + $0x30] sm:$0xe] }
 0x193   : > { %v1377_v31 = vsel %vm1018_vm7, %v1375_v24, %v1376_v25  ;;  %v1460_v32 = vmul.f32 %v3159_v33, %v1306_v9  ;;  %v1592_v35 = vunpack.c.l.bf16 %v1576_v21  ;;  %v1512_v17 = vrot.slane %v1458_v28, 2 }
 0x194   : > { %v2034_v37 = vunpack.c.l.b16 %v1986_v26  ;;  %v1379_v38 = vsel %vm1018_vm7, %v1376_v25, %v1378_v27  ;;  %v1422_v41 = vadd.f32 %v1377_v31, %v1285_v15  ;;  %v2033_v49 = vunpack.c.l.b16 %v1985_v30  ;;  %v1238_v31 = vld [vmem:[#allocation2 + $0x3c] sm:$0xff]  }
 0x195   : > { %v1423_v56 = vadd.f32 %v1379_v38, %v1286_v23  ;;  %v1513_v43 = vrot.slane %v1459_v29, 2  ;;  %v1515_v48 = vrot.slane %v1460_v32, 2  ;;  %v1593_v50 = vunpack.c.h.bf16 %v1576_v21 }
 0x196   : > { %v1609_v34 = vmul.f32 %v3182_v59, %v1592_v35  ;;  %v1646_v53 = vunpack.c.l.bf16 %v1638_v36  ;;  %v1661_v54 = vmul.f32 %v3185_v61, %v1592_v35  ;;  %v2047_v55 = vpack.c.b16 %v2034_v37, %v2033_v49 }
 0x197   : > { %v1514_v58 = vsel %vm1156_vm8, %v1512_v17, %v1513_v43  ;;  %v1516_v60 = vsel %vm1156_vm8, %v1513_v43, %v1515_v48  ;;  %v1783_v62 = vunpack.c.l.bf16 %v1775_v42  ;;  %v1610_v0 = vmul.f32 %v3182_v59, %v1593_v50 }
 0x198   : > { %v1559_v63 = vadd.f32 %v1514_v58, %v1422_v41  ;;  %v1560_v47 = vadd.f32 %v1516_v60, %v1423_v56  ;;  %v1662_v1 = vmul.f32 %v3185_v61, %v1593_v50  ;;  %2127 = vmatmul.bf16.gmra.mxu1 %v2047_v55  ;;  %v1663_v2 = vmul.f32 %v3185_v61, %v1646_v53 }
 0x199   : > { %v1715_v3 = vrot.slane %v1661_v54, 1  ;;  %v1798_v4 = vmul.f32 %v3172_v20, %v1783_v62  ;;  %v1799_v5 = vmul.f32 %v3172_v20, %v1593_v50  ;;  %v1800_v10 = vmul.f32 %v3172_v20, %v1646_v53  ;;  %v1299_v54 = vld [vmem:[#allocation2 + $0x44] sm:$0x1] }
 0x19a   : > { %v1625_v6 = vadd.f32 %v1609_v34, %v1559_v63  ;;  %v1626_v7 = vadd.f32 %v1610_v0, %v1560_v47  ;;  %v1716_v9 = vrot.slane %v1662_v1, 1  ;;  %v1718_v11 = vrot.slane %v1663_v2, 1  ;;  %v1436_v1 = vld [vmem:[#allocation2 + $0x3c] sm:$0xe] }
 0x19b   : > { %v1852_v12 = vrot.slane %v1798_v4, 2  ;;  %v1853_v13 = vrot.slane %v1799_v5, 2  ;;  %v929_v14 = vmul.f32 %v3297_v40, %v3121_v46  ;;  %v1855_v16 = vrot.slane %v1800_v10, 2 }
 0x19c   : > { %v1717_v15 = vsel %vm1018_vm7, %v1715_v3, %v1716_v9  ;;  %v930_v18 = vmul.f32 %v3300_v51, %v3121_v46  ;;  %v965_v21 = vunpack.c.l.bf16 %v957_v44  ;;  %v1719_v23 = vsel %vm1018_vm7, %v1716_v9, %v1718_v11 }
 0x19d   : > { %v1762_v24 = vadd.f32 %v1717_v15, %v1625_v6  ;;  %v1854_v25 = vsel %vm1156_vm8, %v1852_v12, %v1853_v13  ;;  %v982_v26 = vmul.f32 %v3297_v40, %v3124_v52  ;;  %v1763_v27 = vadd.f32 %v1719_v23, %v1626_v7 }
 0x19e   : > { %v1856_v28 = vsel %vm1156_vm8, %v1853_v13, %v1855_v16  ;;  %v983_v29 = vmul.f32 %v3300_v51, %v3124_v52  ;;  %v984_v30 = vmul.f32 %v3124_v52, %v965_v21  ;;  %v1103_v36 = vunpack.c.l.bf16 %v1095_v22 }
 0x19f   : > { %v1899_v32 = vadd.f32 %v1854_v25, %v1762_v24  ;;  %v1039_v35 = vrot.slane %v982_v26, 1  ;;  %v1121_v37 = vmul.f32 %v3300_v51, %v3127_v57  ;;  %v1900_v38 = vadd.f32 %v1856_v28, %v1763_v27 }
 0x1a0   : > { %v1040_v41 = vrot.slane %v983_v29, 1  ;;  %v1042_v17 = vrot.slane %v984_v30, 1  ;;  %v1122_v40 = vmul.f32 %v3127_v57, %v965_v21  ;;  %v1120_v49 = vmul.f32 %v3127_v57, %v1103_v36  ;;  %v1639_v30 = vld [vmem:[#allocation2 + $0x50] sm:$0x1] }
 0x1a1   : > { %v1919_v42 = vmul.f32 %v3215_v39, %v1899_v32  ;;  %v1178_v56 = vrot.slane %v1121_v37, 2  ;;  %v1254_v43 = vunpack.c.l.bf16 %v1238_v31  ;;  %v1920_v48 = vmul.f32 %v3215_v39, %v1900_v38  ;;  %v1776_v37 = vld [vmem:[#allocation2 + $0x48] sm:$0xe] }
 0x1a2   : > { %v1041_v50 = vsel %vm1018_vm7, %v1039_v35, %v1040_v41  ;;  %v1043_v34 = vsel %vm1018_vm7, %v1040_v41, %v1042_v17  ;;  %v1180_v53 = vrot.slane %v1122_v40, 2  ;;  %v1177_v60 = vrot.slane %v1120_v49, 2 }
 0x1a3   : > { %v1939_v51 = vadd.f32 %v3225_v45, %v1919_v42  ;;  %v1083_v55 = vadd.f32 %v1041_v50, %v929_v14  ;;  %v1084_v58 = vadd.f32 %v1043_v34, %v930_v18  ;;  %v1940_v62 = vadd.f32 %v3225_v45, %v1920_v48  ;;  %v2630_v14 = vld [vmem:[#allocation2 + $0x48] sm:$0xff]  }
 0x1a4   : > { %v1181_v63 = vsel %vm1156_vm8, %v1178_v56, %v1180_v53  ;;  %v1255_v47 = vunpack.c.h.bf16 %v1238_v31  ;;  %v1271_v0 = vmul.f32 %v3141_v8, %v1254_v43  ;;  %v1179_v3 = vsel %vm1156_vm8, %v1177_v60, %v1178_v56  ;;  %v898_v60 = vld [vmem:[#allocation2 + $0x3c] sm:$0xff]  }
 0x1a5   : > { %v1955_v2 = vmax.f32 %v1939_v51, 0.0  ;;  %v1222_v4 = vadd.f32 %v1181_v63, %v1084_v58  ;;  %v1307_v5 = vunpack.c.l.bf16 %v1299_v54  ;;  %v1956_v44 = vmax.f32 %v1940_v62, 0.0 }
 0x1a6   : > { %v1221_v6 = vadd.f32 %v1179_v3, %v1083_v55  ;;  %v1272_v7 = vmul.f32 %v3141_v8, %v1255_v47  ;;  %v1324_v9 = vmul.f32 %v3150_v19, %v1254_v43  ;;  %v1325_v11 = vmul.f32 %v3150_v19, %v1255_v47 }
 0x1a7   : > { %v1971_v10 = vmin.f32 %v1955_v2, 6.0  ;;  %v1326_v12 = vmul.f32 %v3150_v19, %v1307_v5  ;;  %v1444_v13 = vunpack.c.l.bf16 %v1436_v1  ;;  %v1972_v15 = vmin.f32 %v1956_v44, 6.0 }
 0x1a8   : > { %v1287_v16 = vadd.f32 %v1271_v0, %v1221_v6  ;;  %v1288_v18 = vadd.f32 %v1272_v7, %v1222_v4  ;;  %v1380_v21 = vrot.slane %v1324_v9, 1  ;;  %v1381_v23 = vrot.slane %v1325_v11, 1 }
 0x1a9   : > { %v1987_v22 = vpack.c.bf16 %v1971_v10, %v1971_v10  ;;  %v1383_v24 = vrot.slane %v1326_v12, 1  ;;  %v1461_v25 = vmul.f32 %v3159_v33, %v1444_v13  ;;  %v1988_v26 = vpack.c.bf16 %v1972_v15, %v1972_v15 }
 0x1aa   : > { %v1462_v27 = vmul.f32 %v3159_v33, %v1255_v47  ;;  %v1463_v28 = vmul.f32 %v3159_v33, %v1307_v5  ;;  %v3395_v29 = vunpack.c.l.bf16 %v2630_v14  ;;  %v1382_v32 = vsel %vm1018_vm7, %v1380_v21, %v1381_v23  ;;  %v958_v5 = vld [vmem:[#allocation2 + $0x44] sm:$0x1]  ;;  %v1096_v21 = vld [vmem:[#allocation2 + $0x3c] sm:$0xe] }
 0x1ab   : > { %v2035_v31 = vunpack.c.l.b16 %v1987_v22  ;;  %v1384_v35 = vsel %vm1018_vm7, %v1381_v23, %v1383_v24  ;;  %v1517_v36 = vrot.slane %v1461_v25, 2  ;;  %v2036_v38 = vunpack.c.l.b16 %v1988_v26 }
 0x1ac   : > { %v1424_v41 = vadd.f32 %v1382_v32, %v1287_v16  ;;  %v1425_v17 = vadd.f32 %v1384_v35, %v1288_v18  ;;  %v1518_v40 = vrot.slane %v1462_v27, 2  ;;  %v1520_v42 = vrot.slane %v1463_v28, 2 }
 0x1ad   : > { %v3399_v49 = vunpack.c.h.bf16 %v2630_v14  ;;  %v1611_v56 = vmul.f32 %v3395_v29, %v3182_v59  ;;  %v1647_v43 = vunpack.c.l.bf16 %v1639_v30  ;;  %v2048_v48 = vpack.c.b16 %v2036_v38, %v2035_v31 }
 0x1ae   : > { %v1519_v50 = vsel %vm1156_vm8, %v1517_v36, %v1518_v40  ;;  %v1664_v34 = vmul.f32 %v3395_v29, %v3185_v61  ;;  %v1784_v53 = vunpack.c.l.bf16 %v1776_v37  ;;  %v1521_v54 = vsel %vm1156_vm8, %v1518_v40, %v1520_v42 }
 0x1af   : > { %v1561_v51 = vadd.f32 %v1519_v50, %v1424_v41  ;;  %v1612_v55 = vmul.f32 %v3399_v49, %v3182_v59  ;;  %v1665_v58 = vmul.f32 %v3399_v49, %v3185_v61  ;;  %2132 = vmatmul.bf16.gmra.mxu1 %v2048_v48  ;;  %v1562_v62 = vadd.f32 %v1521_v54, %v1425_v17 }
 0x1b0   : > { %v1666_v63 = vmul.f32 %v3185_v61, %v1647_v43  ;;  %v1720_v47 = vrot.slane %v1664_v34, 1  ;;  %v1801_v0 = vmul.f32 %v3172_v20, %v1784_v53  ;;  %v1802_v3 = vmul.f32 %v3172_v20, %v3399_v49 }
 0x1b1   : > { %v1627_v1 = vadd.f32 %v1611_v56, %v1561_v51  ;;  %v1721_v2 = vrot.slane %v1665_v58, 1  ;;  %v1803_v4 = vmul.f32 %v3172_v20, %v1647_v43  ;;  %v1628_v44 = vadd.f32 %v1612_v55, %v1562_v62  ;;  %v1300_v43 = vld [vmem:[#allocation2 + $0x50] sm:$0x1] }
 0x1b2   : > { %v1723_v6 = vrot.slane %v1666_v63, 1  ;;  %v1857_v7 = vrot.slane %v1801_v0, 2  ;;  %v914_v9 = vunpack.c.l.bf16 %v898_v60  ;;  %v1858_v11 = vrot.slane %v1802_v3, 2 }
 0x1b3   : > { %v1722_v10 = vsel %vm1018_vm7, %v1720_v47, %v1721_v2  ;;  %v1860_v12 = vrot.slane %v1803_v4, 2  ;;  %v915_v13 = vunpack.c.h.bf16 %v898_v60  ;;  %v966_v18 = vunpack.c.l.bf16 %v958_v5  ;;  %v1437_v47 = vld [vmem:[#allocation2 + $0x48] sm:$0xe] }
 0x1b4   : > { %v1724_v14 = vsel %vm1018_vm7, %v1721_v2, %v1723_v6  ;;  %v1764_v15 = vadd.f32 %v1722_v10, %v1627_v1  ;;  %v931_v16 = vmul.f32 %v3121_v46, %v914_v9  ;;  %v1859_v20 = vsel %vm1156_vm8, %v1857_v7, %v1858_v11 }
 0x1b5   : > { %v1765_v22 = vadd.f32 %v1724_v14, %v1628_v44  ;;  %v1861_v23 = vsel %vm1156_vm8, %v1858_v11, %v1860_v12  ;;  %v932_v24 = vmul.f32 %v3121_v46, %v915_v13  ;;  %v985_v26 = vmul.f32 %v3124_v52, %v914_v9  ;;  %v1580_v11 = vld [vmem:[#allocation2 + $0x54] sm:$0xff]  }
 0x1b6   : > { %v1901_v25 = vadd.f32 %v1859_v20, %v1764_v15  ;;  %v986_v27 = vmul.f32 %v3124_v52, %v915_v13  ;;  %v987_v28 = vmul.f32 %v3124_v52, %v966_v18  ;;  %v1104_v31 = vunpack.c.l.bf16 %v1096_v21 }
 0x1b7   : > { %v1902_v30 = vadd.f32 %v1861_v23, %v1765_v22  ;;  %v1124_v32 = vmul.f32 %v3127_v57, %v915_v13  ;;  %v1125_v35 = vmul.f32 %v3127_v57, %v966_v18  ;;  %v1044_v37 = vrot.slane %v985_v26, 1  ;;  %v1640_v26 = vld [vmem:[#allocation2 + $0x5c] sm:$0x1] }
 0x1b8   : > { %v1921_v36 = vmul.f32 %v3215_v39, %v1901_v25  ;;  %v1045_v38 = vrot.slane %v986_v27, 1  ;;  %v1047_v41 = vrot.slane %v987_v28, 1  ;;  %v1123_v40 = vmul.f32 %v3127_v57, %v1104_v31  ;;  %v1777_v27 = vld [vmem:[#allocation2 + $0x54] sm:$0xe] }
 0x1b9   : > { %v1922_v17 = vmul.f32 %v3215_v39, %v1902_v30  ;;  %v1183_v42 = vrot.slane %v1124_v32, 2  ;;  %v1185_v56 = vrot.slane %v1125_v35, 2  ;;  %v1273_v53 = vmul.f32 %v3395_v29, %v3141_v8 }
 0x1ba   : > { %v1941_v48 = vadd.f32 %v3225_v45, %v1921_v36  ;;  %v1046_v50 = vsel %vm1018_vm7, %v1044_v37, %v1045_v38  ;;  %v1048_v34 = vsel %vm1018_vm7, %v1045_v38, %v1047_v41  ;;  %v1182_v58 = vrot.slane %v1123_v40, 2 }
 0x1bb   : > { %v1942_v54 = vadd.f32 %v3225_v45, %v1922_v17  ;;  %v1085_v51 = vadd.f32 %v1046_v50, %v931_v16  ;;  %v1086_v55 = vadd.f32 %v1048_v34, %v932_v24  ;;  %v1186_v60 = vsel %vm1156_vm8, %v1183_v42, %v1185_v56 }
 0x1bc   : > { %v1957_v39 = vmax.f32 %v1941_v48, 0.0  ;;  %v1274_v62 = vmul.f32 %v3399_v49, %v3141_v8  ;;  %v1308_v63 = vunpack.c.l.bf16 %v1300_v43  ;;  %v1184_v1 = vsel %vm1156_vm8, %v1182_v58, %v1183_v42  ;;  %v3461_v58 = vld [vmem:[%s3691_s4 + $0x8] ss:$0 sm:$0xff] }
 0x1bd   : > { %v1958_v0 = vmax.f32 %v1942_v54, 0.0  ;;  %v1224_v2 = vadd.f32 %v1186_v60, %v1086_v55  ;;  %v1327_v3 = vmul.f32 %v3395_v29, %v3150_v19  ;;  %v1223_v45 = vadd.f32 %v1184_v1, %v1085_v51 }
 0x1be   : > { %v1973_v4 = vmin.f32 %v1957_v39, 6.0  ;;  %v1328_v5 = vmul.f32 %v3399_v49, %v3150_v19  ;;  %v1329_v44 = vmul.f32 %v3150_v19, %v1308_v63  ;;  %v1445_v10 = vunpack.c.l.bf16 %v1437_v47 }
 0x1bf   : > { %v1974_v6 = vmin.f32 %v1958_v0, 6.0  ;;  %v1290_v7 = vadd.f32 %v1274_v62, %v1224_v2  ;;  %v1385_v9 = vrot.slane %v1327_v3, 1  ;;  %v1289_v13 = vadd.f32 %v1273_v53, %v1223_v45 }
 0x1c0   : > { %v1989_v12 = vpack.c.bf16 %v1973_v4, %v1973_v4  ;;  %v1386_v14 = vrot.slane %v1328_v5, 1  ;;  %v1388_v15 = vrot.slane %v1329_v44, 1  ;;  %v1464_v18 = vmul.f32 %v3159_v33, %v1445_v10  ;;  %v1097_v44 = vld [vmem:[#allocation2 + $0x48] sm:$0xe] }
 0x1c1   : > { %v1990_v16 = vpack.c.bf16 %v1974_v6, %v1974_v6  ;;  %v1465_v21 = vmul.f32 %v3399_v49, %v3159_v33  ;;  %v1466_v22 = vmul.f32 %v3159_v33, %v1308_v63  ;;  %v1596_v25 = vunpack.c.l.bf16 %v1580_v11  ;;  %v959_v63 = vld [vmem:[#allocation2 + $0x50] sm:$0x1] }
 0x1c2   : > { %v2037_v20 = vunpack.c.l.b16 %v1989_v12  ;;  %v1387_v23 = vsel %vm1018_vm7, %v1385_v9, %v1386_v14  ;;  %v1389_v24 = vsel %vm1018_vm7, %v1386_v14, %v1388_v15  ;;  %v1522_v32 = vrot.slane %v1464_v18, 2 }
 0x1c3   : > { %v2038_v28 = vunpack.c.l.b16 %v1990_v16  ;;  %v1426_v30 = vadd.f32 %v1387_v23, %v1289_v13  ;;  %v1427_v31 = vadd.f32 %v1389_v24, %v1290_v7  ;;  %v1523_v35 = vrot.slane %v1465_v21, 2 }
 0x1c4   : > { %v1525_v36 = vrot.slane %v1466_v22, 2  ;;  %v1597_v37 = vunpack.c.h.bf16 %v1580_v11  ;;  %v1613_v38 = vmul.f32 %v3182_v59, %v1596_v25  ;;  %v1648_v17 = vunpack.c.l.bf16 %v1640_v26  ;;  %v1242_v22 = vld [vmem:[#allocation2 + $0x54] sm:$0xff]   ;;  %v3485_v26 = vld [vmem:[%s3692_s5] ss:$0 sm:$0xff] }
 0x1c5   : > { %v2049_v41 = vpack.c.b16 %v2038_v28, %v2037_v20  ;;  %v1667_v40 = vmul.f32 %v3185_v61, %v1596_v25  ;;  %v1785_v42 = vunpack.c.l.bf16 %v1777_v27  ;;  %v1524_v56 = vsel %vm1156_vm8, %v1522_v32, %v1523_v35 }
 0x1c6   : > { %v1526_v43 = vsel %vm1156_vm8, %v1523_v35, %v1525_v36  ;;  %v1614_v48 = vmul.f32 %v3182_v59, %v1597_v37  ;;  %v1668_v50 = vmul.f32 %v3185_v61, %v1597_v37  ;;  %v1563_v34 = vadd.f32 %v1524_v56, %v1426_v30 }
 0x1c7   : > { %2137 = vmatmul.bf16.gmra.mxu1 %v2049_v41  ;;  %v1564_v53 = vadd.f32 %v1526_v43, %v1427_v31  ;;  %v1669_v54 = vmul.f32 %v3185_v61, %v1648_v17  ;;  %v1725_v51 = vrot.slane %v1667_v40, 1  ;;  %v1804_v39 = vmul.f32 %v3461_v58, %v1785_v42  ;;  %v1301_v40 = vld [vmem:[#allocation2 + $0x5c] sm:$0x1] }
 0x1c8   : > { %v1726_v55 = vrot.slane %v1668_v50, 1  ;;  %v1805_v60 = vmul.f32 %v3461_v58, %v1597_v37  ;;  %v1806_v62 = vmul.f32 %v3461_v58, %v1648_v17  ;;  %v1629_v47 = vadd.f32 %v1613_v38, %v1563_v34 }
 0x1c9   : > { %v1630_v0 = vadd.f32 %v1614_v48, %v1564_v53  ;;  %v1728_v1 = vrot.slane %v1669_v54, 1  ;;  %v933_v2 = vmul.f32 %v3395_v29, %v3121_v46  ;;  %v1862_v4 = vrot.slane %v1804_v39, 2 }
 0x1ca   : > { %v1727_v3 = vsel %vm1018_vm7, %v1725_v51, %v1726_v55  ;;  %v1863_v45 = vrot.slane %v1805_v60, 2  ;;  %v1865_v5 = vrot.slane %v1806_v62, 2  ;;  %v934_v9 = vmul.f32 %v3399_v49, %v3121_v46  ;;  %v1438_v51 = vld [vmem:[#allocation2 + $0x54] sm:$0xe] }
 0x1cb   : > { %v1729_v6 = vsel %vm1018_vm7, %v1726_v55, %v1728_v1  ;;  %v1766_v7 = vadd.f32 %v1727_v3, %v1629_v47  ;;  %v967_v10 = vunpack.c.l.bf16 %v959_v63  ;;  %v988_v14 = vmul.f32 %v3395_v29, %v3124_v52 }
 0x1cc   : > { %v1767_v11 = vadd.f32 %v1729_v6, %v1630_v0  ;;  %v1864_v12 = vsel %vm1156_vm8, %v1862_v4, %v1863_v45  ;;  %v1866_v13 = vsel %vm1156_vm8, %v1863_v45, %v1865_v5  ;;  %v989_v16 = vmul.f32 %v3399_v49, %v3124_v52  ;;  %v2631_v5 = vld [vmem:[#allocation2 + $0x60] sm:$0xff]  }
 0x1cd   : > { %v1903_v15 = vadd.f32 %v1864_v12, %v1766_v7  ;;  %v990_v18 = vmul.f32 %v3124_v52, %v967_v10  ;;  %v1105_v21 = vunpack.c.l.bf16 %v1097_v44  ;;  %v1049_v23 = vrot.slane %v988_v14, 1 }
 0x1ce   : > { %v1904_v20 = vadd.f32 %v1866_v13, %v1767_v11  ;;  %v1127_v24 = vmul.f32 %v3399_v49, %v3127_v57  ;;  %v1128_v25 = vmul.f32 %v3127_v57, %v967_v10  ;;  %v1050_v27 = vrot.slane %v989_v16, 1  ;;  %v3493_v49 = vld [vmem:[%s3693_s6] ss:$0 sm:$0xff] }
 0x1cf   : > { %v1923_v29 = vmul.f32 %v3485_v26, %v1903_v15  ;;  %v1052_v28 = vrot.slane %v990_v18, 1  ;;  %v1126_v30 = vmul.f32 %v3127_v57, %v1105_v21  ;;  %v1258_v36 = vunpack.c.l.bf16 %v1242_v22  ;;  %v1641_v21 = vld [vmem:[#allocation2 + $0x68] sm:$0x1] }
 0x1d0   : > { %v1924_v31 = vmul.f32 %v3485_v26, %v1904_v20  ;;  %v1188_v32 = vrot.slane %v1127_v24, 2  ;;  %v1190_v35 = vrot.slane %v1128_v25, 2  ;;  %v1051_v38 = vsel %vm1018_vm7, %v1049_v23, %v1050_v27 }
 0x1d1   : > { %v1943_v37 = vadd.f32 %v3493_v49, %v1923_v29  ;;  %v1053_v41 = vsel %vm1018_vm7, %v1050_v27, %v1052_v28  ;;  %v1187_v17 = vrot.slane %v1126_v30, 2  ;;  %v1087_v56 = vadd.f32 %v1051_v38, %v933_v2 }
 0x1d2   : > { %v1944_v42 = vadd.f32 %v3493_v49, %v1924_v31  ;;  %v1088_v43 = vadd.f32 %v1053_v41, %v934_v9  ;;  %v1191_v48 = vsel %vm1156_vm8, %v1188_v32, %v1190_v35  ;;  %v1259_v53 = vunpack.c.h.bf16 %v1242_v22 }
 0x1d3   : > { %v1959_v50 = vmax.f32 %v1943_v37, 0.0  ;;  %v1189_v34 = vsel %vm1156_vm8, %v1187_v17, %v1188_v32  ;;  %v1275_v54 = vmul.f32 %v3141_v8, %v1258_v36  ;;  %v1309_v62 = vunpack.c.l.bf16 %v1301_v40  ;;  %v902_v40 = vld [vmem:[#allocation2 + $0x54] sm:$0xff]  }
 0x1d4   : > { %v1960_v55 = vmax.f32 %v1944_v42, 0.0  ;;  %v1225_v39 = vadd.f32 %v1189_v34, %v1087_v56  ;;  %v1226_v60 = vadd.f32 %v1191_v48, %v1088_v43  ;;  %v1276_v47 = vmul.f32 %v3141_v8, %v1259_v53 }
 0x1d5   : > { %v1975_v63 = vmin.f32 %v1959_v50, 6.0  ;;  %v1330_v0 = vmul.f32 %v3150_v19, %v1258_v36  ;;  %v1331_v1 = vmul.f32 %v3150_v19, %v1259_v53  ;;  %v1332_v4 = vmul.f32 %v3150_v19, %v1309_v62  ;;  %v1778_v36 = vld [vmem:[#allocation2 + $0x60] sm:$0xe] }
 0x1d6   : > { %v1976_v2 = vmin.f32 %v1960_v55, 6.0  ;;  %v1291_v3 = vadd.f32 %v1275_v54, %v1225_v39  ;;  %v1446_v45 = vunpack.c.l.bf16 %v1438_v51  ;;  %v1292_v6 = vadd.f32 %v1276_v47, %v1226_v60 }
 0x1d7   : > { %v1991_v44 = vpack.c.bf16 %v1975_v63, %v1975_v63  ;;  %v1390_v7 = vrot.slane %v1330_v0, 1  ;;  %v1391_v9 = vrot.slane %v1331_v1, 1  ;;  %v1393_v11 = vrot.slane %v1332_v4, 1 }
 0x1d8   : > { %v1992_v10 = vpack.c.bf16 %v1976_v2, %v1976_v2  ;;  %v1467_v12 = vmul.f32 %v3159_v33, %v1446_v45  ;;  %v1468_v13 = vmul.f32 %v3159_v33, %v1259_v53  ;;  %v1469_v16 = vmul.f32 %v3159_v33, %v1309_v62  ;;  %v960_v62 = vld [vmem:[#allocation2 + $0x5c] sm:$0x1]  ;;  %v1098_v2 = vld [vmem:[#allocation2 + $0x54] sm:$0xe] }
 0x1d9   : > { %v2039_v14 = vunpack.c.l.b16 %v1991_v44  ;;  %v1392_v15 = vsel %vm1018_vm7, %v1390_v7, %v1391_v9  ;;  %v3510_v18 = vunpack.c.l.bf16 %v2631_v5  ;;  %v1394_v20 = vsel %vm1018_vm7, %v1391_v9, %v1393_v11 }
 0x1da   : > { %v2040_v22 = vunpack.c.l.b16 %v1992_v10  ;;  %v1428_v23 = vadd.f32 %v1392_v15, %v1291_v3  ;;  %v1527_v24 = vrot.slane %v1467_v12, 2  ;;  %v1429_v25 = vadd.f32 %v1394_v20, %v1292_v6 }
 0x1db   : > { %v1528_v29 = vrot.slane %v1468_v13, 2  ;;  %v1530_v27 = vrot.slane %v1469_v16, 2  ;;  %v3513_v28 = vunpack.c.h.bf16 %v2631_v5  ;;  %v1615_v31 = vmul.f32 %v3510_v18, %v3182_v59 }
 0x1dc   : > { %v2050_v30 = vpack.c.b16 %v2040_v22, %v2039_v14  ;;  %v1649_v32 = vunpack.c.l.bf16 %v1641_v21  ;;  %v1670_v35 = vmul.f32 %v3510_v18, %v3185_v61  ;;  %v1786_v34 = vunpack.c.l.bf16 %v1778_v36 }
 0x1dd   : > { %v1529_v37 = vsel %vm1156_vm8, %v1527_v24, %v1528_v29  ;;  %v1531_v38 = vsel %vm1156_vm8, %v1528_v29, %v1530_v27  ;;  %v1616_v41 = vmul.f32 %v3513_v28, %v3182_v59  ;;  %v1671_v17 = vmul.f32 %v3513_v28, %v3185_v61 }
 0x1de   : > { %2142 = vmatmul.bf16.vlgmr.msra.gmra.mxu3 %v2050_v30  ;;  %v1565_v42 = vadd.f32 %v1529_v37, %v1428_v23  ;;  %v1566_v56 = vadd.f32 %v1531_v38, %v1429_v25  ;;  %v1672_v43 = vmul.f32 %v3185_v61, %v1649_v32  ;;  %v1730_v48 = vrot.slane %v1670_v35, 1  ;;  %v1302_v35 = vld [vmem:[#allocation2 + $0x68] sm:$0x1] }
 0x1df   : > { %v1731_v50 = vrot.slane %v1671_v17, 1  ;;  %v1808_v53 = vmul.f32 %v3461_v58, %v3513_v28  ;;  %v1809_v54 = vmul.f32 %v3461_v58, %v1649_v32  ;;  %v918_v60 = vunpack.c.l.bf16 %v902_v40 }
 0x1e0   : > { %v1631_v51 = vadd.f32 %v1615_v31, %v1565_v42  ;;  %v1632_v55 = vadd.f32 %v1616_v41, %v1566_v56  ;;  %v1733_v39 = vrot.slane %v1672_v43, 1  ;;  %v1807_v47 = vmul.f32 %v3461_v58, %v1786_v34  ;;  %v1439_v56 = vld [vmem:[#allocation2 + $0x60] sm:$0xe] }
 0x1e1   : > { %v1732_v63 = vsel %vm1018_vm7, %v1730_v48, %v1731_v50  ;;  %v1868_v0 = vrot.slane %v1808_v53, 2  ;;  %v1870_v1 = vrot.slane %v1809_v54, 2  ;;  %v919_v45 = vunpack.c.h.bf16 %v902_v40 }
 0x1e2   : > { %v1734_v3 = vsel %vm1018_vm7, %v1731_v50, %v1733_v39  ;;  %v1768_v4 = vadd.f32 %v1732_v63, %v1631_v51  ;;  %v935_v5 = vmul.f32 %v3121_v46, %v918_v60  ;;  %v1867_v6 = vrot.slane %v1807_v47, 2 }
 0x1e3   : > { %v1769_v44 = vadd.f32 %v1734_v3, %v1632_v55  ;;  %v1871_v7 = vsel %vm1156_vm8, %v1868_v0, %v1870_v1  ;;  %v968_v9 = vunpack.c.l.bf16 %v960_v62  ;;  %v936_v10 = vmul.f32 %v3121_v46, %v919_v45 }
 0x1e4   : > { %v991_v11 = vmul.f32 %v3124_v52, %v918_v60  ;;  %v992_v12 = vmul.f32 %v3124_v52, %v919_v45  ;;  %v1106_v13 = vunpack.c.l.bf16 %v1098_v2  ;;  %v1869_v14 = vsel %vm1156_vm8, %v1867_v6, %v1868_v0 }
 0x1e5   : > { %v1906_v15 = vadd.f32 %v1871_v7, %v1769_v44  ;;  %v993_v16 = vmul.f32 %v3124_v52, %v968_v9  ;;  %v1130_v21 = vmul.f32 %v3127_v57, %v919_v45  ;;  %v1905_v22 = vadd.f32 %v1869_v14, %v1768_v4  ;;  %v1779_v14 = vld [vmem:[#allocation2 + $0x6c] sm:$0xe] }
 0x1e6   : > { %v1054_v20 = vrot.slane %v991_v11, 1  ;;  %v1055_v23 = vrot.slane %v992_v12, 1  ;;  %v1129_v24 = vmul.f32 %v3127_v57, %v1106_v13  ;;  %v1131_v29 = vmul.f32 %v3127_v57, %v968_v9  ;;  %v1642_v9 = vld [vmem:[#allocation2 + $0x74] sm:$0x1] }
 0x1e7   : > { %v1926_v25 = vmul.f32 %v3485_v26, %v1906_v15  ;;  %v1057_v46 = vrot.slane %v993_v16, 1  ;;  %v1193_v27 = vrot.slane %v1130_v21, 2  ;;  %v1925_v30 = vmul.f32 %v3485_v26, %v1905_v22  ;;  %v2118_v47 = vpop.f32.mrf.mxu1 }
 0x1e8   : > { %v1056_v31 = vsel %vm1018_vm7, %v1054_v20, %v1055_v23  ;;  %v1192_v32 = vrot.slane %v1129_v24, 2  ;;  %v1277_v52 = vmul.f32 %v3510_v18, %v3141_v8  ;;  %v1195_v41 = vrot.slane %v1131_v29, 2 }
 0x1e9   : > { %v1946_v36 = vadd.f32 %v3493_v49, %v1926_v25  ;;  %v1058_v37 = vsel %vm1018_vm7, %v1055_v23, %v1057_v46  ;;  %v1089_v38 = vadd.f32 %v1056_v31, %v935_v5  ;;  %v1945_v17 = vadd.f32 %v3493_v49, %v1925_v30 }
 0x1ea   : > { %v1090_v40 = vadd.f32 %v1058_v37, %v936_v10  ;;  %v1194_v57 = vsel %vm1156_vm8, %v1192_v32, %v1193_v27  ;;  %v1278_v42 = vmul.f32 %v3513_v28, %v3141_v8  ;;  %v1196_v48 = vsel %vm1156_vm8, %v1193_v27, %v1195_v41  ;;  %v1584_v8 = vld [vmem:[#allocation2 + $0x6c] sm:$0xff]   ;;  %v3572_v27 = vld [vmem:[%s3695_s8] ss:$0 sm:$0xff] }
 0x1eb   : > { %v1962_v43 = vmax.f32 %v1946_v36, 0.0  ;;  %v1227_v50 = vadd.f32 %v1194_v57, %v1089_v38  ;;  %v1310_v34 = vunpack.c.l.bf16 %v1302_v35  ;;  %v1961_v53 = vmax.f32 %v1945_v17, 0.0  ;;  %v3582_v17 = vld [vmem:[%s3696_s9] ss:$0 sm:$0xff] }
 0x1ec   : > { %v1228_v54 = vadd.f32 %v1196_v48, %v1090_v40  ;;  %v1333_v51 = vmul.f32 %v3510_v18, %v3150_v19  ;;  %v1334_v55 = vmul.f32 %v3513_v28, %v3150_v19  ;;  %v1447_v63 = vunpack.c.l.bf16 %v1439_v56 }
 0x1ed   : > { %v1978_v39 = vmin.f32 %v1962_v43, 6.0  ;;  %v1293_v60 = vadd.f32 %v1277_v52, %v1227_v50  ;;  %v1335_v62 = vmul.f32 %v3150_v19, %v1310_v34  ;;  %v1977_v0 = vmin.f32 %v1961_v53, 6.0 }
 0x1ee   : > { %v1294_v1 = vadd.f32 %v1278_v42, %v1228_v54  ;;  %v1395_v2 = vrot.slane %v1333_v51, 1  ;;  %v1396_v3 = vrot.slane %v1334_v55, 1  ;;  %v1470_v5 = vmul.f32 %v3159_v33, %v1447_v63 }
 0x1ef   : > { %v1994_v4 = vpack.c.bf16 %v1978_v39, %v1978_v39  ;;  %v1398_v45 = vrot.slane %v1335_v62, 1  ;;  %v1471_v18 = vmul.f32 %v3513_v28, %v3159_v33  ;;  %v1993_v44 = vpack.c.bf16 %v1977_v0, %v1977_v0  ;;  %v2120_v35 = vpop.f32.mrf.mxu1 }
 0x1f0   : > { %v1397_v6 = vsel %vm1018_vm7, %v1395_v2, %v1396_v3  ;;  %v1472_v7 = vmul.f32 %v3159_v33, %v1310_v34  ;;  %v1600_v19 = vunpack.c.l.bf16 %v1584_v8  ;;  %v1532_v13 = vrot.slane %v1470_v5, 2 }
 0x1f1   : > { %v2042_v10 = vunpack.c.l.b16 %v1994_v4  ;;  %v1399_v11 = vsel %vm1018_vm7, %v1396_v3, %v1398_v45  ;;  %v1430_v12 = vadd.f32 %v1397_v6, %v1293_v60  ;;  %v2041_v15 = vunpack.c.l.b16 %v1993_v44 }
 0x1f2   : > { %v1431_v16 = vadd.f32 %v1399_v11, %v1294_v1  ;;  %v1533_v21 = vrot.slane %v1471_v18, 2  ;;  %v1535_v22 = vrot.slane %v1472_v7, 2  ;;  %v1601_v20 = vunpack.c.h.bf16 %v1584_v8 }
 0x1f3   : > { %v1617_v28 = vmul.f32 %v3182_v59, %v1600_v19  ;;  %v1650_v23 = vunpack.c.l.bf16 %v1642_v9  ;;  %v1673_v24 = vmul.f32 %v3185_v61, %v1600_v19  ;;  %v2051_v25 = vpack.c.b16 %v2042_v10, %v2041_v15 }
 0x1f4   : > { %v1534_v33 = vsel %vm1156_vm8, %v1532_v13, %v1533_v21  ;;  %v1536_v46 = vsel %vm1156_vm8, %v1533_v21, %v1535_v22  ;;  %v1787_v29 = vunpack.c.l.bf16 %v1779_v14  ;;  %v1618_v32 = vmul.f32 %v3182_v59, %v1601_v20 }
 0x1f5   : > { %v1567_v30 = vadd.f32 %v1534_v33, %v1430_v12  ;;  %v1568_v31 = vadd.f32 %v1536_v46, %v1431_v16  ;;  %v1674_v52 = vmul.f32 %v3185_v61, %v1601_v20  ;;  %2147 = vmatmul.bf16.gmra.mxu3 %v2051_v25  ;;  %v1675_v36 = vmul.f32 %v3185_v61, %v1650_v23 }
 0x1f6   : > { %v1735_v37 = vrot.slane %v1673_v24, 1  ;;  %v1810_v38 = vmul.f32 %v3461_v58, %v1787_v29  ;;  %v1811_v41 = vmul.f32 %v3461_v58, %v1601_v20  ;;  %v1812_v59 = vmul.f32 %v3461_v58, %v1650_v23 }
 0x1f7   : > { %v1633_v40 = vadd.f32 %v1617_v28, %v1567_v30  ;;  %v1634_v57 = vadd.f32 %v1618_v32, %v1568_v31  ;;  %v1736_v42 = vrot.slane %v1674_v52, 1  ;;  %v1738_v56 = vrot.slane %v1675_v36, 1 }
 0x1f8   : > { %v1872_v43 = vrot.slane %v1810_v38, 2  ;;  %v1873_v48 = vrot.slane %v1811_v41, 2  ;;  %v2162_v61 = vmul.f32 %v3572_v27, %v2118_v47  ;;  %v1875_v34 = vrot.slane %v1812_v59, 2 }
 0x1f9   : > { %v1737_v50 = vsel %vm1018_vm7, %v1735_v37, %v1736_v42  ;;  %v1739_v53 = vsel %vm1018_vm7, %v1736_v42, %v1738_v56  ;;  %v2163_v58 = vmul.f32 %v3572_v27, %v2120_v35 }
 0x1fa   : > { %v1770_v54 = vadd.f32 %v1737_v50, %v1633_v40  ;;  %v1874_v51 = vsel %vm1156_vm8, %v1872_v43, %v1873_v48  ;;  %v2182_v55 = vadd.f32 %v3582_v17, %v2162_v61  ;;  %v1771_v39 = vadd.f32 %v1739_v53, %v1634_v57 }
 0x1fb   : > { %v1876_v60 = vsel %vm1156_vm8, %v1873_v48, %v1875_v34  ;;  %v2183_v2 = vadd.f32 %v3582_v17, %v2163_v58 }
 0x1fc   : > { %v1907_v62 = vadd.f32 %v1874_v51, %v1770_v54  ;;  %2198 = vxpose.xlu0.b32.start [1/16] %v2182_v55, 128  ;;  %v1908_v63 = vadd.f32 %v1876_v60, %v1771_v39 }
 0x1fe   : > { %v1927_v8 = vmul.f32 %v3485_v26, %v1907_v62  ;;  %v1928_v47 = vmul.f32 %v3485_v26, %v1908_v63  ;;  %v2123_v0 = vpop.f32.mrf.mxu1 }
 0x1ff   : > { %v2164_v18 = vmul.f32 %v3572_v27, %v2123_v0 }
 0x200   : > { %v1947_v1 = vadd.f32 %v3493_v49, %v1927_v8  ;;  %v1948_v3 = vadd.f32 %v3493_v49, %v1928_v47 }
 0x201   : > { %v2184_v9 = vadd.f32 %v3582_v17, %v2164_v18 }
 0x202   : > { %v1963_v4 = vmax.f32 %v1947_v1, 0.0  ;;  %v1964_v45 = vmax.f32 %v1948_v3, 0.0 }
 0x204   : > { %v1979_v5 = vmin.f32 %v1963_v4, 6.0  ;;  %2199 = vxpose.xlu0.b32.cont [2/16] %v2183_v2, 128  ;;  %v1980_v44 = vmin.f32 %v1964_v45, 6.0 }
 0x206   : > { %v1995_v6 = vpack.c.bf16 %v1979_v5, %v1979_v5  ;;  %v1996_v7 = vpack.c.bf16 %v1980_v44, %v1980_v44  ;;  %v2125_v10 = vpop.f32.mrf.mxu1 }
 0x207   : > { %v2165_v12 = vmul.f32 %v3572_v27, %v2125_v10 }
 0x208   : > { %v2043_v19 = vunpack.c.l.b16 %v1995_v6  ;;  %v2044_v26 = vunpack.c.l.b16 %v1996_v7 }
 0x209   : > { %v2185_v49 = vadd.f32 %v3582_v17, %v2165_v12 }
 0x20a   : > { %v2052_v11 = vpack.c.b16 %v2044_v26, %v2043_v19 }
 0x20c   : > { %2200 = vxpose.xlu0.b32.cont [3/16] %v2184_v9, 128  ;;  %2152 = vmatmul.bf16.gmra.mxu3 %v2052_v11 }
 0x214   : > { %2201 = vxpose.xlu0.b32.cont [4/16] %v2185_v49, 128 }
 0x215   : > { %v2128_v13 = vpop.f32.mrf.mxu1 }
 0x216   : > { %v2166_v14 = vmul.f32 %v3572_v27, %v2128_v13 }
 0x218   : > { %v2186_v15 = vadd.f32 %v3582_v17, %v2166_v14 }
 0x21c   : > { %2202 = vxpose.xlu0.b32.cont [5/16] %v2186_v15, 128 }
 0x21d   : > { %v2130_v16 = vpop.f32.mrf.mxu1 }
 0x21e   : > { %v2167_v21 = vmul.f32 %v3572_v27, %v2130_v16 }
 0x220   : > { %v2187_v22 = vadd.f32 %v3582_v17, %v2167_v21 }
 0x224   : > { %2203 = vxpose.xlu0.b32.cont [6/16] %v2187_v22, 128 }
 0x22c   : > { %v2133_v20 = vpop.f32.mrf.mxu1 }
 0x22d   : > { %v2168_v28 = vmul.f32 %v3572_v27, %v2133_v20 }
 0x22f   : > { %v2188_v23 = vadd.f32 %v3582_v17, %v2168_v28 }
 0x231   : > { %2204 = vxpose.xlu0.b32.cont [7/16] %v2188_v23, 128 }
 0x234   : > { %v2135_v24 = vpop.f32.mrf.mxu1 }
 0x235   : > { %v2169_v25 = vmul.f32 %v3572_v27, %v2135_v24 }
 0x237   : > { %v2189_v33 = vadd.f32 %v3582_v17, %v2169_v25 }
 0x239   : > { %2205 = vxpose.xlu0.b32.cont [8/16] %v2189_v33, 128 }
 0x244   : > { %v2138_v46 = vpop.f32.mrf.mxu1 }
 0x245   : > { %v2170_v29 = vmul.f32 %v3572_v27, %v2138_v46 }
 0x247   : > { %v2190_v30 = vadd.f32 %v3582_v17, %v2170_v29 }
 0x249   : > { %2206 = vxpose.xlu0.b32.cont [9/16] %v2190_v30, 128 }
 0x24c   : > { %v2140_v31 = vpop.f32.mrf.mxu1 }
 0x24d   : > { %v2171_v32 = vmul.f32 %v3572_v27, %v2140_v31 }
 0x24f   : > { %v2191_v52 = vadd.f32 %v3582_v17, %v2171_v32 }
 0x251   : > { %2207 = vxpose.xlu0.b32.cont [10/16] %v2191_v52, 128 }
 0x261   : > { %v2143_v35 = vpop.f32.mrf.mxu3 }
 0x262   : > { %v2172_v36 = vmul.f32 %v3572_v27, %v2143_v35 }
 0x264   : > { %v2192_v37 = vadd.f32 %v3582_v17, %v2172_v36 }
 0x266   : > { %2208 = vxpose.xlu0.b32.cont [11/16] %v2192_v37, 128 }
 0x269   : > { %v2145_v38 = vpop.f32.mrf.mxu3 }
 0x26a   : > { %v2173_v41 = vmul.f32 %v3572_v27, %v2145_v38 }
 0x26c   : > { %v2193_v40 = vadd.f32 %v3582_v17, %v2173_v41 }
 0x26e   : > { %2209 = vxpose.xlu0.b32.cont [12/16] %v2193_v40, 128 }
 0x278   : > { %v2148_v57 = vpop.f32.mrf.mxu3 }
 0x279   : > { %v2174_v42 = vmul.f32 %v3572_v27, %v2148_v57 }
 0x27b   : > { %v2194_v59 = vadd.f32 %v3582_v17, %v2174_v42 }
 0x27d   : > { %2210 = vxpose.xlu0.b32.cont [13/16] %v2194_v59, 128 }
 0x280   : > { %v2150_v56 = vpop.f32.mrf.mxu3 }
 0x281   : > { %v2175_v43 = vmul.f32 %v3572_v27, %v2150_v56 }
 0x283   : > { %v2195_v48 = vadd.f32 %v3582_v17, %v2175_v43 }
 0x285   : > { %2211 = vxpose.xlu0.b32.cont [14/16] %v2195_v48, 128 }
 0x28f   : > { %v2153_v61 = vpop.f32.mrf.mxu3 }
 0x290   : > { %v2176_v50 = vmul.f32 %v3572_v27, %v2153_v61 }
 0x292   : > { %v2196_v34 = vadd.f32 %v3582_v17, %v2176_v50 }
 0x294   : > { %2212 = vxpose.xlu0.b32.cont [15/16] %v2196_v34, 128 }
 0x297   : > { %v2155_v53 = vpop.f32.mrf.mxu3 }
 0x298   : > { %v2177_v54 = vmul.f32 %v3572_v27, %v2155_v53 }
 0x29a   : > { %v2197_v51 = vadd.f32 %v3582_v17, %v2177_v54 }
 0x29c   : > { %2213 = vxpose.xlu0.b32.end [16/16] %v2197_v51, 128 }
 0x2c8   : > { %v2214_v55 = vpop.trf.xlu0 }
 0x2c9   : > { %2230 = vst [vmem:[%s3105_s18] sm:$0xff] %v2214_v55 }
 0x2d0   : > { %v2215_v39 = vpop.trf.xlu0 }
 0x2d1   : > { %2231 = vst [vmem:[%s3105_s18 + $0x8] sm:$0xff] %v2215_v39 }
 0x2d8   : > { %v2216_v60 = vpop.trf.xlu0 }
 0x2d9   : > { %2232 = vst [vmem:[%s3105_s18 + $0x10] sm:$0xff] %v2216_v60 }
 0x2e0   : > { %v2217_v62 = vpop.trf.xlu0 }
 0x2e1   : > { %2233 = vst [vmem:[%s3105_s18 + $0x18] sm:$0xff] %v2217_v62 }
 0x2e8   : > { %v2218_v58 = vpop.trf.xlu0 }
 0x2e9   : > { %2234 = vst [vmem:[%s3105_s18 + $0x20] sm:$0xff] %v2218_v58 }
 0x2f0   : > { %v2219_v27 = vpop.trf.xlu0 }
 0x2f1   : > { %2235 = vst [vmem:[%s3105_s18 + $0x28] sm:$0xff] %v2219_v27 }
 0x2f8   : > { %v2220_v17 = vpop.trf.xlu0 }
 0x2f9   : > { %2236 = vst [vmem:[%s3105_s18 + $0x30] sm:$0xff] %v2220_v17 }
 0x300   : > { %v2221_v63 = vpop.trf.xlu0 }
 0x301   : > { %2237 = vst [vmem:[%s3105_s18 + $0x38] sm:$0xff] %v2221_v63 }
 0x308   : > { %v2222_v8 = vpop.trf.xlu0 }
 0x309   : > { %2238 = vst [vmem:[%s3105_s18 + $0x40] sm:$0xff] %v2222_v8 }
 0x310   : > { %v2223_v47 = vpop.trf.xlu0 }
 0x311   : > { %2239 = vst [vmem:[%s3105_s18 + $0x48] sm:$0xff] %v2223_v47 }
 0x318   : > { %v2224_v0 = vpop.trf.xlu0 }
 0x319   : > { %2240 = vst [vmem:[%s3105_s18 + $0x50] sm:$0xff] %v2224_v0 }
 0x320   : > { %v2225_v1 = vpop.trf.xlu0 }
 0x321   : > { %2241 = vst [vmem:[%s3105_s18 + $0x58] sm:$0xff] %v2225_v1 }
 0x328   : > { %v2226_v2 = vpop.trf.xlu0 }
 0x329   : > { %2242 = vst [vmem:[%s3105_s18 + $0x60] sm:$0xff] %v2226_v2 }
 0x330   : > { %v2227_v3 = vpop.trf.xlu0 }
 0x331   : > { %2243 = vst [vmem:[%s3105_s18 + $0x68] sm:$0xff] %v2227_v3 }
 0x338   : > { %v2228_v4 = vpop.trf.xlu0 }
 0x339   : > { %2244 = vst [vmem:[%s3105_s18 + $0x70] sm:$0xff] %v2228_v4 }
 0x340   : > { %v2229_v45 = vpop.trf.xlu0 }
 0x341   : > { %2245 = vst [vmem:[%s3105_s18 + $0x78] sm:$0xff] %v2229_v45 }
 0x342   : > { %2755 = shalt.err (!%p2752_p9)
}
 0x343   : > { %s2826_s24 = smov 128   ;;  %s2827_s18 = smov 256  }
 0x344   : > { %s2828_s29 = smov 8  }
 0x345   : > { %2642 = dma.vmem_to_hbm [thread:$0]  (%p2935_p3), %s2261_s21, 2048, %s2263_s19, %s2247_s23, %s2826_s24, %s2827_s18, %s2828_s29  }
 0x346 PF: > { %p2648_p10 = scmp.ge.s32.totalorder %s2822_s20, 2  ;;  %s2277_s12 = sand.u32 1, %s2794_s13  }
 0x347   : > { %s2278_s0 = scalar_lea.sflag [#allocation4], %s2277_s12 }
 0x348   : > { %p2645_p11 = pnand %p2648_p10, %p2944_p8 }
 0x34a   : > { %p2646_p12 = pneg %p2645_p11 }
 0x34c   : > { %2789 = dma.done.wait (%p2646_p12), %s2278_s0, 2048  }
 0x34d   : > { %2791 = vsyncadd (%p2646_p12), %s2278_s0, 4294965248  ;;  %s23_s20 = sadd.s32 1, %s2822_s20   ;;  %s3714_s16 = sld [smem:[#allocation6_spill]] }
 0x34e   : > { %p20_p13 = scmp.ge.s32.totalorder %s23_s20, 6   ;;  %s3715_s17 = sld [smem:[#allocation7_spill]] }
 0x34f   : > { %s3716_s18 = sld [smem:[#allocation8_spill]]  ;;  %s3718_s13 = smov %s2798_s14 }
 0x350   : > { %s3717_s19 = sld [smem:[#allocation9_spill]]  ;;  %s3719_s14 = smov %s2802_s15 }
 0x351   : > { %s3720_s15 = smov %s2953_s11  ;;  %22 = sbr.rel (!%p20_p13) target bundleno = 7 (0x7), region = 107 }
 0x356   :  { %2284 = vsyncpa [#allocation4], 1 }
 0x357   :  { %2286 = vsyncpa [#allocation4 + $0x1], 1 }

</bundles_post_ra>
